<compile_context>
chip_gen: v7x
topology: tpu7x:2x2x1
jax: 0.10.0
libtpu: 0.0.40
codegen_flags: <defaults>
</compile_context>

<pallas_src>
import math

import jax
import jax.numpy as jnp
from jax import lax
from jax.experimental import pallas as pl
from jax.experimental.pallas import tpu as pltpu


def _vmem_spec():
    # full-array block resident in VMEM
    return pl.BlockSpec(memory_space=pltpu.MemorySpace.VMEM)


# --------------------------------------------------------------------------
# Single fused kernel
#   x_ref      : (T*B, D_in)   time-major rows (t, b) of the input features
#   mask_ref   : (B, 1, T)     >0 marks padded key positions
#   wih_ref    : (D_in, 8H)    fused fwd(0:4H) / bwd(4H:8H) LSTM input projections
#   whh_f/b    : (H, 4H)       LSTM recurrent weights per direction
#   b_ref      : (1, 8H)       fused (b_ih + b_hh) for both directions
#   wqkv/bqkv  : (E, 3E)/(1,3E) fused q/k/v in_proj (transposed), E = 2H
#   wo/bo      : (E, E)/(1, E) attention out_proj
#   gamma..var : (1, E)        BatchNorm1d (eval) params / running stats
#   wc/bc      : (E, C)/(1, C) classifier
#   out_ref    : (B, C)        logits
#   gates_ref  : (T*B, 8H)     scratch: hoisted LSTM input projection
#   xbt_ref    : (B*T, E)      scratch: LSTM output, batch-major rows (b, t)
# --------------------------------------------------------------------------
def tc_base_kernel(x_ref, mask_ref, wih_ref, whh_f_ref, whh_b_ref, b_ref,
                   wqkv_ref, bqkv_ref, wo_ref, bo_ref,
                   gamma_ref, beta_ref, mu_ref, var_ref, wc_ref, bc_ref,
                   out_ref, gates_ref, xbt_ref):
    H = whh_f_ref.shape[0]
    E = 2 * H
    B, _, T = mask_ref.shape

    # ---- LSTM: hoisted input projection for both directions (bias folded) ----
    gates_ref[...] = (jnp.dot(x_ref[...], wih_ref[...],
                              preferred_element_type=jnp.float32)
                      + b_ref[...])

    whh_f = whh_f_ref[...]
    whh_b = whh_b_ref[...]

    def cell(g_in, h, c, whh):
        # PyTorch gate order: i, f, g, o
        g = g_in + jnp.dot(h, whh, preferred_element_type=jnp.float32)   # (B, 4H)
        i = jax.nn.sigmoid(g[:, 0 * H:1 * H])
        f = jax.nn.sigmoid(g[:, 1 * H:2 * H])
        gg = jnp.tanh(g[:, 2 * H:3 * H])
        o = jax.nn.sigmoid(g[:, 3 * H:4 * H])
        c_new = f * c + i * gg
        return o * jnp.tanh(c_new), c_new

    zeros = jnp.zeros((B, H), jnp.float32)

    def body(i, carry):
        h_f, c_f, h_b, c_b = carry
        tb = T - 1 - i
        # precomputed input gates for this timestep, both directions
        g_f = gates_ref[pl.ds(i * B, B), 0:4 * H]        # (B, 4H) fwd, time i
        g_b = gates_ref[pl.ds(tb * B, B), 4 * H:8 * H]   # (B, 4H) bwd, time T-1-i
        h_f, c_f = cell(g_f, h_f, c_f, whh_f)
        h_b, c_b = cell(g_b, h_b, c_b, whh_b)
        # batch-major rows (b*T + t): attention reads contiguous (T, E) slabs
        for b in range(B):                               # B is small & static
            xbt_ref[pl.ds(b * T + i, 1), 0:H] = h_f[b:b + 1, :]
            xbt_ref[pl.ds(b * T + tb, 1), H:2 * H] = h_b[b:b + 1, :]
        return (h_f, c_f, h_b, c_b)

    lax.fori_loop(0, T, body, (zeros, zeros, zeros, zeros), unroll=True)

    # Dropout -> identity (eval semantics).

    # ---- single-head attention + key_padding_mask + pooled readout ----
    qkv = (jnp.dot(xbt_ref[...], wqkv_ref[...],
                   preferred_element_type=jnp.float32)
           + bqkv_ref[...])                                             # (B*T, 3E)
    qkv = qkv.reshape(B, T, 3 * E)
    scale = 1.0 / math.sqrt(E)            # num_heads = 1 -> head_dim = E
    q = qkv[:, :, 0:E] * scale
    k = qkv[:, :, E:2 * E]
    v = qkv[:, :, 2 * E:3 * E]

    scores = jnp.einsum('bqd,bkd->bqk', q, k,
                        preferred_element_type=jnp.float32)             # (B, T, T)
    scores = jnp.where(mask_ref[...] > 0.5, -1e30, scores)              # pad keys

    m = jnp.max(scores, axis=-1, keepdims=True)
    e = jnp.exp(scores - m)
    p = e * pl.reciprocal(jnp.sum(e, axis=-1, keepdims=True), approx=True)

    # AdaptiveAvgPool1d(1) commutes with the linear attention readout + out_proj:
    # pool the attention probabilities over the query axis first.
    pbar = jnp.mean(p, axis=1, keepdims=True)                           # (B, 1, T)
    ctx = jnp.einsum('bqk,bkd->bqd', pbar, v,
                     preferred_element_type=jnp.float32).reshape(B, E)  # (B, E)
    o = (jnp.dot(ctx, wo_ref[...], preferred_element_type=jnp.float32)
         + bo_ref[...])                                                 # (B, E)

    # ---- BatchNorm1d (eval, running stats) + classifier ----
    norm = ((o - mu_ref[...]) * lax.rsqrt(var_ref[...] + 1e-5)
            * gamma_ref[...] + beta_ref[...])
    out_ref[...] = (jnp.dot(norm, wc_ref[...], preferred_element_type=jnp.float32)
                    + bc_ref[...])


# --------------------------------------------------------------------------
# Wrapper
# --------------------------------------------------------------------------
def tc_base_forward(features, mask, input_ids_len, params):
    # input_ids_len is accepted (as in the PyTorch signature) but unused.
    del input_ids_len
    B, T, D = features.shape
    H = params["whh_f"].shape[0]
    E = 2 * H
    C = params["wc"].shape[1]

    # time-major rows (t, b) so each LSTM step reads a contiguous (B, 4H) block
    x_flat = jnp.transpose(features, (1, 0, 2)).reshape(T * B, D).astype(jnp.float32)
    mask3 = mask.reshape(B, 1, T).astype(jnp.float32)

    logits = pl.pallas_call(
        tc_base_kernel,
        out_shape=jax.ShapeDtypeStruct((B, C), jnp.float32),
        in_specs=[_vmem_spec()] * 16,
        out_specs=_vmem_spec(),
        scratch_shapes=[
            pltpu.VMEM((T * B, 8 * H), jnp.float32),   # hoisted LSTM gates
            pltpu.VMEM((B * T, E), jnp.float32),       # LSTM output, batch-major
        ],
    )(x_flat, mask3, params["wih"], params["whh_f"], params["whh_b"], params["b"],
      params["wqkv"], params["bqkv"], params["wo"], params["bo"],
      params["bn_gamma"], params["bn_beta"], params["bn_mean"], params["bn_var"],
      params["wc"], params["bc"])
    return logits


# --------------------------------------------------------------------------
# Deterministic synthetic parameter init (shapes follow the PyTorch module)
# --------------------------------------------------------------------------
def init_params(key, in_features, hidden, class_num):
    E = 2 * hidden
    ks = jax.random.split(key, 8)

    def u(k, shape, scale):
        return jax.random.uniform(k, shape, jnp.float32, -scale, scale)

    s_l = 1.0 / math.sqrt(hidden)
    s_e = 1.0 / math.sqrt(E)
    return dict(
        # LSTM: fused input projection (in, 8H) = [fwd 4H | bwd 4H]; recurrent
        # weights per direction (H, 4H); fused bias = bias_ih + bias_hh per dir.
        wih=u(ks[0], (in_features, 8 * hidden), s_l),
        whh_f=u(ks[1], (hidden, 4 * hidden), s_l),
        whh_b=u(ks[2], (hidden, 4 * hidden), s_l),
        b=u(ks[3], (1, 8 * hidden), s_l),
        # MultiheadAttention: fused in_proj q/k/v (stored transposed) + out_proj
        wqkv=u(ks[4], (E, 3 * E), s_e),
        bqkv=jnp.zeros((1, 3 * E), jnp.float32),
        wo=u(ks[5], (E, E), s_e),
        bo=jnp.zeros((1, E), jnp.float32),
        # BatchNorm1d (eval-mode running stats, default init)
        bn_gamma=jnp.ones((1, E), jnp.float32),
        bn_beta=jnp.zeros((1, E), jnp.float32),
        bn_mean=jnp.zeros((1, E), jnp.float32),
        bn_var=jnp.ones((1, E), jnp.float32),
        # classifier Linear(E, class_num), stored transposed
        wc=u(ks[6], (E, class_num), s_e),
        bc=u(ks[7], (1, class_num), s_e),
    )


if __name__ == "__main__":
    B, T = 2, 8
    in_features, hidden, class_num = 16, 32, 4

    key = jax.random.PRNGKey(0)
    kf, kp = jax.random.split(key)
    features = jax.random.normal(kf, (B, T, in_features), jnp.float32)
    # key_padding_mask: 1.0 marks padded key positions (mask.bool() in PyTorch)
    mask = jnp.zeros((B, T), jnp.float32).at[1, -2:].set(1.0)
    input_ids_len = jnp.array([T, T - 2], jnp.int32)   # unused by forward

    params = init_params(kp, in_features, hidden, class_num)

    fwd = jax.jit(tc_base_forward)
    logits = fwd(features, mask, input_ids_len, params)
    logits = jax.block_until_ready(logits)

    assert logits.shape == (B, class_num)
    assert bool(jnp.all(jnp.isfinite(logits)))
    print("KERNEL_OK")
</pallas_src>

<mosaic_0001>
module attributes {stable_mosaic.version = 11 : i64} {
  func.func @tc_base_kernel(%arg0: memref<16x16xf32, #tpu.memory_space<vmem>>, %arg1: memref<2x1x8xf32, #tpu.memory_space<vmem>>, %arg2: memref<16x256xf32, #tpu.memory_space<vmem>>, %arg3: memref<32x128xf32, #tpu.memory_space<vmem>>, %arg4: memref<32x128xf32, #tpu.memory_space<vmem>>, %arg5: memref<1x256xf32, #tpu.memory_space<vmem>>, %arg6: memref<64x192xf32, #tpu.memory_space<vmem>>, %arg7: memref<1x192xf32, #tpu.memory_space<vmem>>, %arg8: memref<64x64xf32, #tpu.memory_space<vmem>>, %arg9: memref<1x64xf32, #tpu.memory_space<vmem>>, %arg10: memref<1x64xf32, #tpu.memory_space<vmem>>, %arg11: memref<1x64xf32, #tpu.memory_space<vmem>>, %arg12: memref<1x64xf32, #tpu.memory_space<vmem>>, %arg13: memref<1x64xf32, #tpu.memory_space<vmem>>, %arg14: memref<64x4xf32, #tpu.memory_space<vmem>>, %arg15: memref<1x4xf32, #tpu.memory_space<vmem>>, %arg16: memref<2x4xf32, #tpu.memory_space<vmem>>, %arg17: memref<16x256xf32, #tpu.memory_space<vmem>>, %arg18: memref<16x64xf32, #tpu.memory_space<vmem>>) attributes {dimension_semantics = [], scalar_prefetch = 0 : i64, scratch_operands = 2 : i64, tpu.core_type = #tpu.core_type<tc>} {
    %c0 = arith.constant 0 : index
    %c0_0 = arith.constant 0 : index
    %0 = vector.load %arg0[%c0, %c0_0] : memref<16x16xf32, #tpu.memory_space<vmem>>, vector<16x16xf32>
    %c0_1 = arith.constant 0 : index
    %c0_2 = arith.constant 0 : index
    %1 = vector.load %arg2[%c0_1, %c0_2] : memref<16x256xf32, #tpu.memory_space<vmem>>, vector<16x256xf32>
    %cst = arith.constant dense<0.000000e+00> : vector<16x256xf32>
    %2 = tpu.matmul %0, %1, %cst {dimension_numbers = #tpu.dot_dimension_numbers<[1], [0], [0], [1], [0, 0, 1, 1], [], []>} : vector<16x16xf32>, vector<16x256xf32>, vector<16x256xf32> -> vector<16x256xf32>
    %c0_3 = arith.constant 0 : index
    %c0_4 = arith.constant 0 : index
    %3 = vector.load %arg5[%c0_3, %c0_4] : memref<1x256xf32, #tpu.memory_space<vmem>>, vector<1x256xf32>
    %4 = vector.broadcast %3 : vector<1x256xf32> to vector<16x256xf32>
    %5 = arith.addf %2, %4 : vector<16x256xf32>
    %c0_5 = arith.constant 0 : index
    %c0_6 = arith.constant 0 : index
    %6 = vector.load %arg17[%c0_5, %c0_6] : memref<16x256xf32, #tpu.memory_space<vmem>>, vector<16x256xf32>
    tpu.vector_store %arg17[%c0_5, %c0_6], %5 {strides = array<i32>} : memref<16x256xf32, #tpu.memory_space<vmem>>, vector<16x256xf32>,
    %c0_7 = arith.constant 0 : index
    %c0_8 = arith.constant 0 : index
    %7 = vector.load %arg3[%c0_7, %c0_8] : memref<32x128xf32, #tpu.memory_space<vmem>>, vector<32x128xf32>
    %c0_9 = arith.constant 0 : index
    %c0_10 = arith.constant 0 : index
    %8 = vector.load %arg4[%c0_9, %c0_10] : memref<32x128xf32, #tpu.memory_space<vmem>>, vector<32x128xf32>
    %cst_11 = arith.constant 0.000000e+00 : f32
    %9 = vector.broadcast %cst_11 : f32 to vector<2x32xf32>
    %c0_i32 = arith.constant 0 : i32
    %c7_i32 = arith.constant 7 : i32
    %10 = arith.subi %c7_i32, %c0_i32 : i32
    %c2_i32 = arith.constant 2 : i32
    %11 = arith.muli %c0_i32, %c2_i32 : i32
    %12 = arith.index_cast %11 : i32 to index
    %c0_12 = arith.constant 0 : index
    %13 = vector.load %arg17[%12, %c0_12] : memref<16x256xf32, #tpu.memory_space<vmem>>, vector<2x128xf32>
    %c2_i32_13 = arith.constant 2 : i32
    %14 = arith.muli %10, %c2_i32_13 : i32
    %15 = arith.index_cast %14 : i32 to index
    %c128 = arith.constant 128 : index
    %16 = vector.load %arg17[%15, %c128] : memref<16x256xf32, #tpu.memory_space<vmem>>, vector<2x128xf32>
    %cst_14 = arith.constant dense<0.000000e+00> : vector<2x128xf32>
    %17 = tpu.matmul %9, %7, %cst_14 {dimension_numbers = #tpu.dot_dimension_numbers<[1], [0], [0], [1], [0, 0, 1, 1], [], []>} : vector<2x32xf32>, vector<32x128xf32>, vector<2x128xf32> -> vector<2x128xf32>
    %18 = arith.addf %13, %17 : vector<2x128xf32>
    %19 = vector.extract_strided_slice %18 {offsets = [0, 0], sizes = [2, 32], strides = [1, 1]} : vector<2x128xf32> to vector<2x32xf32>
    %20 = arith.negf %19 : vector<2x32xf32>
    %21 = math.exp %20 : vector<2x32xf32>
    %cst_15 = arith.constant 1.000000e+00 : f32
    %22 = vector.broadcast %cst_15 : f32 to vector<2x32xf32>
    %23 = arith.addf %22, %21 : vector<2x32xf32>
    %24 = arith.divf %22, %23 : vector<2x32xf32>
    %25 = vector.extract_strided_slice %18 {offsets = [0, 32], sizes = [2, 32], strides = [1, 1]} : vector<2x128xf32> to vector<2x32xf32>
    %26 = arith.negf %25 : vector<2x32xf32>
    %27 = math.exp %26 : vector<2x32xf32>
    %cst_16 = arith.constant 1.000000e+00 : f32
    %28 = vector.broadcast %cst_16 : f32 to vector<2x32xf32>
    %29 = arith.addf %28, %27 : vector<2x32xf32>
    %30 = arith.divf %28, %29 : vector<2x32xf32>
    %31 = vector.extract_strided_slice %18 {offsets = [0, 64], sizes = [2, 32], strides = [1, 1]} : vector<2x128xf32> to vector<2x32xf32>
    %32 = math.tanh %31 : vector<2x32xf32>
    %33 = vector.extract_strided_slice %18 {offsets = [0, 96], sizes = [2, 32], strides = [1, 1]} : vector<2x128xf32> to vector<2x32xf32>
    %34 = arith.negf %33 : vector<2x32xf32>
    %35 = math.exp %34 : vector<2x32xf32>
    %cst_17 = arith.constant 1.000000e+00 : f32
    %36 = vector.broadcast %cst_17 : f32 to vector<2x32xf32>
    %37 = arith.addf %36, %35 : vector<2x32xf32>
    %38 = arith.divf %36, %37 : vector<2x32xf32>
    %39 = arith.mulf %30, %9 : vector<2x32xf32>
    %40 = arith.mulf %24, %32 : vector<2x32xf32>
    %41 = arith.addf %39, %40 : vector<2x32xf32>
    %42 = math.tanh %41 : vector<2x32xf32>
    %43 = arith.mulf %38, %42 : vector<2x32xf32>
    %cst_18 = arith.constant dense<0.000000e+00> : vector<2x128xf32>
    %44 = tpu.matmul %9, %8, %cst_18 {dimension_numbers = #tpu.dot_dimension_numbers<[1], [0], [0], [1], [0, 0, 1, 1], [], []>} : vector<2x32xf32>, vector<32x128xf32>, vector<2x128xf32> -> vector<2x128xf32>
    %45 = arith.addf %16, %44 : vector<2x128xf32>
    %46 = vector.extract_strided_slice %45 {offsets = [0, 0], sizes = [2, 32], strides = [1, 1]} : vector<2x128xf32> to vector<2x32xf32>
    %47 = arith.negf %46 : vector<2x32xf32>
    %48 = math.exp %47 : vector<2x32xf32>
    %cst_19 = arith.constant 1.000000e+00 : f32
    %49 = vector.broadcast %cst_19 : f32 to vector<2x32xf32>
    %50 = arith.addf %49, %48 : vector<2x32xf32>
    %51 = arith.divf %49, %50 : vector<2x32xf32>
    %52 = vector.extract_strided_slice %45 {offsets = [0, 32], sizes = [2, 32], strides = [1, 1]} : vector<2x128xf32> to vector<2x32xf32>
    %53 = arith.negf %52 : vector<2x32xf32>
    %54 = math.exp %53 : vector<2x32xf32>
    %cst_20 = arith.constant 1.000000e+00 : f32
    %55 = vector.broadcast %cst_20 : f32 to vector<2x32xf32>
    %56 = arith.addf %55, %54 : vector<2x32xf32>
    %57 = arith.divf %55, %56 : vector<2x32xf32>
    %58 = vector.extract_strided_slice %45 {offsets = [0, 64], sizes = [2, 32], strides = [1, 1]} : vector<2x128xf32> to vector<2x32xf32>
    %59 = math.tanh %58 : vector<2x32xf32>
    %60 = vector.extract_strided_slice %45 {offsets = [0, 96], sizes = [2, 32], strides = [1, 1]} : vector<2x128xf32> to vector<2x32xf32>
    %61 = arith.negf %60 : vector<2x32xf32>
    %62 = math.exp %61 : vector<2x32xf32>
    %cst_21 = arith.constant 1.000000e+00 : f32
    %63 = vector.broadcast %cst_21 : f32 to vector<2x32xf32>
    %64 = arith.addf %63, %62 : vector<2x32xf32>
    %65 = arith.divf %63, %64 : vector<2x32xf32>
    %66 = arith.mulf %57, %9 : vector<2x32xf32>
    %67 = arith.mulf %51, %59 : vector<2x32xf32>
    %68 = arith.addf %66, %67 : vector<2x32xf32>
    %69 = math.tanh %68 : vector<2x32xf32>
    %70 = arith.mulf %65, %69 : vector<2x32xf32>
    %71 = vector.extract_strided_slice %43 {offsets = [0, 0], sizes = [1, 32], strides = [1, 1]} : vector<2x32xf32> to vector<1x32xf32>
    %c0_i32_22 = arith.constant 0 : i32
    %72 = arith.addi %c0_i32_22, %c0_i32 : i32
    %73 = arith.index_cast %72 : i32 to index
    %c0_23 = arith.constant 0 : index
    %74 = vector.load %arg18[%73, %c0_23] : memref<16x64xf32, #tpu.memory_space<vmem>>, vector<1x32xf32>
    tpu.vector_store %arg18[%73, %c0_23], %71 {strides = array<i32>} : memref<16x64xf32, #tpu.memory_space<vmem>>, vector<1x32xf32>,
    %75 = vector.extract_strided_slice %70 {offsets = [0, 0], sizes = [1, 32], strides = [1, 1]} : vector<2x32xf32> to vector<1x32xf32>
    %c0_i32_24 = arith.constant 0 : i32
    %76 = arith.addi %c0_i32_24, %10 : i32
    %77 = arith.index_cast %76 : i32 to index
    %c32 = arith.constant 32 : index
    %78 = vector.load %arg18[%77, %c32] : memref<16x64xf32, #tpu.memory_space<vmem>>, vector<1x32xf32>
    tpu.vector_store %arg18[%77, %c32], %75 {strides = array<i32>} : memref<16x64xf32, #tpu.memory_space<vmem>>, vector<1x32xf32>,
    %79 = vector.extract_strided_slice %43 {offsets = [1, 0], sizes = [1, 32], strides = [1, 1]} : vector<2x32xf32> to vector<1x32xf32>
    %c8_i32 = arith.constant 8 : i32
    %80 = arith.addi %c8_i32, %c0_i32 : i32
    %81 = arith.index_cast %80 : i32 to index
    %c0_25 = arith.constant 0 : index
    %82 = vector.load %arg18[%81, %c0_25] : memref<16x64xf32, #tpu.memory_space<vmem>>, vector<1x32xf32>
    tpu.vector_store %arg18[%81, %c0_25], %79 {strides = array<i32>} : memref<16x64xf32, #tpu.memory_space<vmem>>, vector<1x32xf32>,
    %83 = vector.extract_strided_slice %70 {offsets = [1, 0], sizes = [1, 32], strides = [1, 1]} : vector<2x32xf32> to vector<1x32xf32>
    %c8_i32_26 = arith.constant 8 : i32
    %84 = arith.addi %c8_i32_26, %10 : i32
    %85 = arith.index_cast %84 : i32 to index
    %c32_27 = arith.constant 32 : index
    %86 = vector.load %arg18[%85, %c32_27] : memref<16x64xf32, #tpu.memory_space<vmem>>, vector<1x32xf32>
    tpu.vector_store %arg18[%85, %c32_27], %83 {strides = array<i32>} : memref<16x64xf32, #tpu.memory_space<vmem>>, vector<1x32xf32>,
    %c1_i32 = arith.constant 1 : i32
    %c7_i32_28 = arith.constant 7 : i32
    %87 = arith.subi %c7_i32_28, %c1_i32 : i32
    %c2_i32_29 = arith.constant 2 : i32
    %88 = arith.muli %c1_i32, %c2_i32_29 : i32
    %89 = arith.index_cast %88 : i32 to index
    %c0_30 = arith.constant 0 : index
    %90 = vector.load %arg17[%89, %c0_30] : memref<16x256xf32, #tpu.memory_space<vmem>>, vector<2x128xf32>
    %c2_i32_31 = arith.constant 2 : i32
    %91 = arith.muli %87, %c2_i32_31 : i32
    %92 = arith.index_cast %91 : i32 to index
    %c128_32 = arith.constant 128 : index
    %93 = vector.load %arg17[%92, %c128_32] : memref<16x256xf32, #tpu.memory_space<vmem>>, vector<2x128xf32>
    %cst_33 = arith.constant dense<0.000000e+00> : vector<2x128xf32>
    %94 = tpu.matmul %43, %7, %cst_33 {dimension_numbers = #tpu.dot_dimension_numbers<[1], [0], [0], [1], [0, 0, 1, 1], [], []>} : vector<2x32xf32>, vector<32x128xf32>, vector<2x128xf32> -> vector<2x128xf32>
    %95 = arith.addf %90, %94 : vector<2x128xf32>
    %96 = vector.extract_strided_slice %95 {offsets = [0, 0], sizes = [2, 32], strides = [1, 1]} : vector<2x128xf32> to vector<2x32xf32>
    %97 = arith.negf %96 : vector<2x32xf32>
    %98 = math.exp %97 : vector<2x32xf32>
    %cst_34 = arith.constant 1.000000e+00 : f32
    %99 = vector.broadcast %cst_34 : f32 to vector<2x32xf32>
    %100 = arith.addf %99, %98 : vector<2x32xf32>
    %101 = arith.divf %99, %100 : vector<2x32xf32>
    %102 = vector.extract_strided_slice %95 {offsets = [0, 32], sizes = [2, 32], strides = [1, 1]} : vector<2x128xf32> to vector<2x32xf32>
    %103 = arith.negf %102 : vector<2x32xf32>
    %104 = math.exp %103 : vector<2x32xf32>
    %cst_35 = arith.constant 1.000000e+00 : f32
    %105 = vector.broadcast %cst_35 : f32 to vector<2x32xf32>
    %106 = arith.addf %105, %104 : vector<2x32xf32>
    %107 = arith.divf %105, %106 : vector<2x32xf32>
    %108 = vector.extract_strided_slice %95 {offsets = [0, 64], sizes = [2, 32], strides = [1, 1]} : vector<2x128xf32> to vector<2x32xf32>
    %109 = math.tanh %108 : vector<2x32xf32>
    %110 = vector.extract_strided_slice %95 {offsets = [0, 96], sizes = [2, 32], strides = [1, 1]} : vector<2x128xf32> to vector<2x32xf32>
    %111 = arith.negf %110 : vector<2x32xf32>
    %112 = math.exp %111 : vector<2x32xf32>
    %cst_36 = arith.constant 1.000000e+00 : f32
    %113 = vector.broadcast %cst_36 : f32 to vector<2x32xf32>
    %114 = arith.addf %113, %112 : vector<2x32xf32>
    %115 = arith.divf %113, %114 : vector<2x32xf32>
    %116 = arith.mulf %107, %41 : vector<2x32xf32>
    %117 = arith.mulf %101, %109 : vector<2x32xf32>
    %118 = arith.addf %116, %117 : vector<2x32xf32>
    %119 = math.tanh %118 : vector<2x32xf32>
    %120 = arith.mulf %115, %119 : vector<2x32xf32>
    %cst_37 = arith.constant dense<0.000000e+00> : vector<2x128xf32>
    %121 = tpu.matmul %70, %8, %cst_37 {dimension_numbers = #tpu.dot_dimension_numbers<[1], [0], [0], [1], [0, 0, 1, 1], [], []>} : vector<2x32xf32>, vector<32x128xf32>, vector<2x128xf32> -> vector<2x128xf32>
    %122 = arith.addf %93, %121 : vector<2x128xf32>
    %123 = vector.extract_strided_slice %122 {offsets = [0, 0], sizes = [2, 32], strides = [1, 1]} : vector<2x128xf32> to vector<2x32xf32>
    %124 = arith.negf %123 : vector<2x32xf32>
    %125 = math.exp %124 : vector<2x32xf32>
    %cst_38 = arith.constant 1.000000e+00 : f32
    %126 = vector.broadcast %cst_38 : f32 to vector<2x32xf32>
    %127 = arith.addf %126, %125 : vector<2x32xf32>
    %128 = arith.divf %126, %127 : vector<2x32xf32>
    %129 = vector.extract_strided_slice %122 {offsets = [0, 32], sizes = [2, 32], strides = [1, 1]} : vector<2x128xf32> to vector<2x32xf32>
    %130 = arith.negf %129 : vector<2x32xf32>
    %131 = math.exp %130 : vector<2x32xf32>
    %cst_39 = arith.constant 1.000000e+00 : f32
    %132 = vector.broadcast %cst_39 : f32 to vector<2x32xf32>
    %133 = arith.addf %132, %131 : vector<2x32xf32>
    %134 = arith.divf %132, %133 : vector<2x32xf32>
    %135 = vector.extract_strided_slice %122 {offsets = [0, 64], sizes = [2, 32], strides = [1, 1]} : vector<2x128xf32> to vector<2x32xf32>
    %136 = math.tanh %135 : vector<2x32xf32>
    %137 = vector.extract_strided_slice %122 {offsets = [0, 96], sizes = [2, 32], strides = [1, 1]} : vector<2x128xf32> to vector<2x32xf32>
    %138 = arith.negf %137 : vector<2x32xf32>
    %139 = math.exp %138 : vector<2x32xf32>
    %cst_40 = arith.constant 1.000000e+00 : f32
    %140 = vector.broadcast %cst_40 : f32 to vector<2x32xf32>
    %141 = arith.addf %140, %139 : vector<2x32xf32>
    %142 = arith.divf %140, %141 : vector<2x32xf32>
    %143 = arith.mulf %134, %68 : vector<2x32xf32>
    %144 = arith.mulf %128, %136 : vector<2x32xf32>
    %145 = arith.addf %143, %144 : vector<2x32xf32>
    %146 = math.tanh %145 : vector<2x32xf32>
    %147 = arith.mulf %142, %146 : vector<2x32xf32>
    %148 = vector.extract_strided_slice %120 {offsets = [0, 0], sizes = [1, 32], strides = [1, 1]} : vector<2x32xf32> to vector<1x32xf32>
    %c0_i32_41 = arith.constant 0 : i32
    %149 = arith.addi %c0_i32_41, %c1_i32 : i32
    %150 = arith.index_cast %149 : i32 to index
    %c0_42 = arith.constant 0 : index
    %151 = vector.load %arg18[%150, %c0_42] : memref<16x64xf32, #tpu.memory_space<vmem>>, vector<1x32xf32>
    tpu.vector_store %arg18[%150, %c0_42], %148 {strides = array<i32>} : memref<16x64xf32, #tpu.memory_space<vmem>>, vector<1x32xf32>,
    %152 = vector.extract_strided_slice %147 {offsets = [0, 0], sizes = [1, 32], strides = [1, 1]} : vector<2x32xf32> to vector<1x32xf32>
    %c0_i32_43 = arith.constant 0 : i32
    %153 = arith.addi %c0_i32_43, %87 : i32
    %154 = arith.index_cast %153 : i32 to index
    %c32_44 = arith.constant 32 : index
    %155 = vector.load %arg18[%154, %c32_44] : memref<16x64xf32, #tpu.memory_space<vmem>>, vector<1x32xf32>
    tpu.vector_store %arg18[%154, %c32_44], %152 {strides = array<i32>} : memref<16x64xf32, #tpu.memory_space<vmem>>, vector<1x32xf32>,
    %156 = vector.extract_strided_slice %120 {offsets = [1, 0], sizes = [1, 32], strides = [1, 1]} : vector<2x32xf32> to vector<1x32xf32>
    %c8_i32_45 = arith.constant 8 : i32
    %157 = arith.addi %c8_i32_45, %c1_i32 : i32
    %158 = arith.index_cast %157 : i32 to index
    %c0_46 = arith.constant 0 : index
    %159 = vector.load %arg18[%158, %c0_46] : memref<16x64xf32, #tpu.memory_space<vmem>>, vector<1x32xf32>
    tpu.vector_store %arg18[%158, %c0_46], %156 {strides = array<i32>} : memref<16x64xf32, #tpu.memory_space<vmem>>, vector<1x32xf32>,
    %160 = vector.extract_strided_slice %147 {offsets = [1, 0], sizes = [1, 32], strides = [1, 1]} : vector<2x32xf32> to vector<1x32xf32>
    %c8_i32_47 = arith.constant 8 : i32
    %161 = arith.addi %c8_i32_47, %87 : i32
    %162 = arith.index_cast %161 : i32 to index
    %c32_48 = arith.constant 32 : index
    %163 = vector.load %arg18[%162, %c32_48] : memref<16x64xf32, #tpu.memory_space<vmem>>, vector<1x32xf32>
    tpu.vector_store %arg18[%162, %c32_48], %160 {strides = array<i32>} : memref<16x64xf32, #tpu.memory_space<vmem>>, vector<1x32xf32>,
    %c2_i32_49 = arith.constant 2 : i32
    %c7_i32_50 = arith.constant 7 : i32
    %164 = arith.subi %c7_i32_50, %c2_i32_49 : i32
    %c2_i32_51 = arith.constant 2 : i32
    %165 = arith.muli %c2_i32_49, %c2_i32_51 : i32
    %166 = arith.index_cast %165 : i32 to index
    %c0_52 = arith.constant 0 : index
    %167 = vector.load %arg17[%166, %c0_52] : memref<16x256xf32, #tpu.memory_space<vmem>>, vector<2x128xf32>
    %c2_i32_53 = arith.constant 2 : i32
    %168 = arith.muli %164, %c2_i32_53 : i32
    %169 = arith.index_cast %168 : i32 to index
    %c128_54 = arith.constant 128 : index
    %170 = vector.load %arg17[%169, %c128_54] : memref<16x256xf32, #tpu.memory_space<vmem>>, vector<2x128xf32>
    %cst_55 = arith.constant dense<0.000000e+00> : vector<2x128xf32>
    %171 = tpu.matmul %120, %7, %cst_55 {dimension_numbers = #tpu.dot_dimension_numbers<[1], [0], [0], [1], [0, 0, 1, 1], [], []>} : vector<2x32xf32>, vector<32x128xf32>, vector<2x128xf32> -> vector<2x128xf32>
    %172 = arith.addf %167, %171 : vector<2x128xf32>
    %173 = vector.extract_strided_slice %172 {offsets = [0, 0], sizes = [2, 32], strides = [1, 1]} : vector<2x128xf32> to vector<2x32xf32>
    %174 = arith.negf %173 : vector<2x32xf32>
    %175 = math.exp %174 : vector<2x32xf32>
    %cst_56 = arith.constant 1.000000e+00 : f32
    %176 = vector.broadcast %cst_56 : f32 to vector<2x32xf32>
    %177 = arith.addf %176, %175 : vector<2x32xf32>
    %178 = arith.divf %176, %177 : vector<2x32xf32>
    %179 = vector.extract_strided_slice %172 {offsets = [0, 32], sizes = [2, 32], strides = [1, 1]} : vector<2x128xf32> to vector<2x32xf32>
    %180 = arith.negf %179 : vector<2x32xf32>
    %181 = math.exp %180 : vector<2x32xf32>
    %cst_57 = arith.constant 1.000000e+00 : f32
    %182 = vector.broadcast %cst_57 : f32 to vector<2x32xf32>
    %183 = arith.addf %182, %181 : vector<2x32xf32>
    %184 = arith.divf %182, %183 : vector<2x32xf32>
    %185 = vector.extract_strided_slice %172 {offsets = [0, 64], sizes = [2, 32], strides = [1, 1]} : vector<2x128xf32> to vector<2x32xf32>
    %186 = math.tanh %185 : vector<2x32xf32>
    %187 = vector.extract_strided_slice %172 {offsets = [0, 96], sizes = [2, 32], strides = [1, 1]} : vector<2x128xf32> to vector<2x32xf32>
    %188 = arith.negf %187 : vector<2x32xf32>
    %189 = math.exp %188 : vector<2x32xf32>
    %cst_58 = arith.constant 1.000000e+00 : f32
    %190 = vector.broadcast %cst_58 : f32 to vector<2x32xf32>
    %191 = arith.addf %190, %189 : vector<2x32xf32>
    %192 = arith.divf %190, %191 : vector<2x32xf32>
    %193 = arith.mulf %184, %118 : vector<2x32xf32>
    %194 = arith.mulf %178, %186 : vector<2x32xf32>
    %195 = arith.addf %193, %194 : vector<2x32xf32>
    %196 = math.tanh %195 : vector<2x32xf32>
    %197 = arith.mulf %192, %196 : vector<2x32xf32>
    %cst_59 = arith.constant dense<0.000000e+00> : vector<2x128xf32>
    %198 = tpu.matmul %147, %8, %cst_59 {dimension_numbers = #tpu.dot_dimension_numbers<[1], [0], [0], [1], [0, 0, 1, 1], [], []>} : vector<2x32xf32>, vector<32x128xf32>, vector<2x128xf32> -> vector<2x128xf32>
    %199 = arith.addf %170, %198 : vector<2x128xf32>
    %200 = vector.extract_strided_slice %199 {offsets = [0, 0], sizes = [2, 32], strides = [1, 1]} : vector<2x128xf32> to vector<2x32xf32>
    %201 = arith.negf %200 : vector<2x32xf32>
    %202 = math.exp %201 : vector<2x32xf32>
    %cst_60 = arith.constant 1.000000e+00 : f32
    %203 = vector.broadcast %cst_60 : f32 to vector<2x32xf32>
    %204 = arith.addf %203, %202 : vector<2x32xf32>
    %205 = arith.divf %203, %204 : vector<2x32xf32>
    %206 = vector.extract_strided_slice %199 {offsets = [0, 32], sizes = [2, 32], strides = [1, 1]} : vector<2x128xf32> to vector<2x32xf32>
    %207 = arith.negf %206 : vector<2x32xf32>
    %208 = math.exp %207 : vector<2x32xf32>
    %cst_61 = arith.constant 1.000000e+00 : f32
    %209 = vector.broadcast %cst_61 : f32 to vector<2x32xf32>
    %210 = arith.addf %209, %208 : vector<2x32xf32>
    %211 = arith.divf %209, %210 : vector<2x32xf32>
    %212 = vector.extract_strided_slice %199 {offsets = [0, 64], sizes = [2, 32], strides = [1, 1]} : vector<2x128xf32> to vector<2x32xf32>
    %213 = math.tanh %212 : vector<2x32xf32>
    %214 = vector.extract_strided_slice %199 {offsets = [0, 96], sizes = [2, 32], strides = [1, 1]} : vector<2x128xf32> to vector<2x32xf32>
    %215 = arith.negf %214 : vector<2x32xf32>
    %216 = math.exp %215 : vector<2x32xf32>
    %cst_62 = arith.constant 1.000000e+00 : f32
    %217 = vector.broadcast %cst_62 : f32 to vector<2x32xf32>
    %218 = arith.addf %217, %216 : vector<2x32xf32>
    %219 = arith.divf %217, %218 : vector<2x32xf32>
    %220 = arith.mulf %211, %145 : vector<2x32xf32>
    %221 = arith.mulf %205, %213 : vector<2x32xf32>
    %222 = arith.addf %220, %221 : vector<2x32xf32>
    %223 = math.tanh %222 : vector<2x32xf32>
    %224 = arith.mulf %219, %223 : vector<2x32xf32>
    %225 = vector.extract_strided_slice %197 {offsets = [0, 0], sizes = [1, 32], strides = [1, 1]} : vector<2x32xf32> to vector<1x32xf32>
    %c0_i32_63 = arith.constant 0 : i32
    %226 = arith.addi %c0_i32_63, %c2_i32_49 : i32
    %227 = arith.index_cast %226 : i32 to index
    %c0_64 = arith.constant 0 : index
    %228 = vector.load %arg18[%227, %c0_64] : memref<16x64xf32, #tpu.memory_space<vmem>>, vector<1x32xf32>
    tpu.vector_store %arg18[%227, %c0_64], %225 {strides = array<i32>} : memref<16x64xf32, #tpu.memory_space<vmem>>, vector<1x32xf32>,
    %229 = vector.extract_strided_slice %224 {offsets = [0, 0], sizes = [1, 32], strides = [1, 1]} : vector<2x32xf32> to vector<1x32xf32>
    %c0_i32_65 = arith.constant 0 : i32
    %230 = arith.addi %c0_i32_65, %164 : i32
    %231 = arith.index_cast %230 : i32 to index
    %c32_66 = arith.constant 32 : index
    %232 = vector.load %arg18[%231, %c32_66] : memref<16x64xf32, #tpu.memory_space<vmem>>, vector<1x32xf32>
    tpu.vector_store %arg18[%231, %c32_66], %229 {strides = array<i32>} : memref<16x64xf32, #tpu.memory_space<vmem>>, vector<1x32xf32>,
    %233 = vector.extract_strided_slice %197 {offsets = [1, 0], sizes = [1, 32], strides = [1, 1]} : vector<2x32xf32> to vector<1x32xf32>
    %c8_i32_67 = arith.constant 8 : i32
    %234 = arith.addi %c8_i32_67, %c2_i32_49 : i32
    %235 = arith.index_cast %234 : i32 to index
    %c0_68 = arith.constant 0 : index
    %236 = vector.load %arg18[%235, %c0_68] : memref<16x64xf32, #tpu.memory_space<vmem>>, vector<1x32xf32>
    tpu.vector_store %arg18[%235, %c0_68], %233 {strides = array<i32>} : memref<16x64xf32, #tpu.memory_space<vmem>>, vector<1x32xf32>,
    %237 = vector.extract_strided_slice %224 {offsets = [1, 0], sizes = [1, 32], strides = [1, 1]} : vector<2x32xf32> to vector<1x32xf32>
    %c8_i32_69 = arith.constant 8 : i32
    %238 = arith.addi %c8_i32_69, %164 : i32
    %239 = arith.index_cast %238 : i32 to index
    %c32_70 = arith.constant 32 : index
    %240 = vector.load %arg18[%239, %c32_70] : memref<16x64xf32, #tpu.memory_space<vmem>>, vector<1x32xf32>
    tpu.vector_store %arg18[%239, %c32_70], %237 {strides = array<i32>} : memref<16x64xf32, #tpu.memory_space<vmem>>, vector<1x32xf32>,
    %c3_i32 = arith.constant 3 : i32
    %c7_i32_71 = arith.constant 7 : i32
    %241 = arith.subi %c7_i32_71, %c3_i32 : i32
    %c2_i32_72 = arith.constant 2 : i32
    %242 = arith.muli %c3_i32, %c2_i32_72 : i32
    %243 = arith.index_cast %242 : i32 to index
    %c0_73 = arith.constant 0 : index
    %244 = vector.load %arg17[%243, %c0_73] : memref<16x256xf32, #tpu.memory_space<vmem>>, vector<2x128xf32>
    %c2_i32_74 = arith.constant 2 : i32
    %245 = arith.muli %241, %c2_i32_74 : i32
    %246 = arith.index_cast %245 : i32 to index
    %c128_75 = arith.constant 128 : index
    %247 = vector.load %arg17[%246, %c128_75] : memref<16x256xf32, #tpu.memory_space<vmem>>, vector<2x128xf32>
    %cst_76 = arith.constant dense<0.000000e+00> : vector<2x128xf32>
    %248 = tpu.matmul %197, %7, %cst_76 {dimension_numbers = #tpu.dot_dimension_numbers<[1], [0], [0], [1], [0, 0, 1, 1], [], []>} : vector<2x32xf32>, vector<32x128xf32>, vector<2x128xf32> -> vector<2x128xf32>
    %249 = arith.addf %244, %248 : vector<2x128xf32>
    %250 = vector.extract_strided_slice %249 {offsets = [0, 0], sizes = [2, 32], strides = [1, 1]} : vector<2x128xf32> to vector<2x32xf32>
    %251 = arith.negf %250 : vector<2x32xf32>
    %252 = math.exp %251 : vector<2x32xf32>
    %cst_77 = arith.constant 1.000000e+00 : f32
    %253 = vector.broadcast %cst_77 : f32 to vector<2x32xf32>
    %254 = arith.addf %253, %252 : vector<2x32xf32>
    %255 = arith.divf %253, %254 : vector<2x32xf32>
    %256 = vector.extract_strided_slice %249 {offsets = [0, 32], sizes = [2, 32], strides = [1, 1]} : vector<2x128xf32> to vector<2x32xf32>
    %257 = arith.negf %256 : vector<2x32xf32>
    %258 = math.exp %257 : vector<2x32xf32>
    %cst_78 = arith.constant 1.000000e+00 : f32
    %259 = vector.broadcast %cst_78 : f32 to vector<2x32xf32>
    %260 = arith.addf %259, %258 : vector<2x32xf32>
    %261 = arith.divf %259, %260 : vector<2x32xf32>
    %262 = vector.extract_strided_slice %249 {offsets = [0, 64], sizes = [2, 32], strides = [1, 1]} : vector<2x128xf32> to vector<2x32xf32>
    %263 = math.tanh %262 : vector<2x32xf32>
    %264 = vector.extract_strided_slice %249 {offsets = [0, 96], sizes = [2, 32], strides = [1, 1]} : vector<2x128xf32> to vector<2x32xf32>
    %265 = arith.negf %264 : vector<2x32xf32>
    %266 = math.exp %265 : vector<2x32xf32>
    %cst_79 = arith.constant 1.000000e+00 : f32
    %267 = vector.broadcast %cst_79 : f32 to vector<2x32xf32>
    %268 = arith.addf %267, %266 : vector<2x32xf32>
    %269 = arith.divf %267, %268 : vector<2x32xf32>
    %270 = arith.mulf %261, %195 : vector<2x32xf32>
    %271 = arith.mulf %255, %263 : vector<2x32xf32>
    %272 = arith.addf %270, %271 : vector<2x32xf32>
    %273 = math.tanh %272 : vector<2x32xf32>
    %274 = arith.mulf %269, %273 : vector<2x32xf32>
    %cst_80 = arith.constant dense<0.000000e+00> : vector<2x128xf32>
    %275 = tpu.matmul %224, %8, %cst_80 {dimension_numbers = #tpu.dot_dimension_numbers<[1], [0], [0], [1], [0, 0, 1, 1], [], []>} : vector<2x32xf32>, vector<32x128xf32>, vector<2x128xf32> -> vector<2x128xf32>
    %276 = arith.addf %247, %275 : vector<2x128xf32>
    %277 = vector.extract_strided_slice %276 {offsets = [0, 0], sizes = [2, 32], strides = [1, 1]} : vector<2x128xf32> to vector<2x32xf32>
    %278 = arith.negf %277 : vector<2x32xf32>
    %279 = math.exp %278 : vector<2x32xf32>
    %cst_81 = arith.constant 1.000000e+00 : f32
    %280 = vector.broadcast %cst_81 : f32 to vector<2x32xf32>
    %281 = arith.addf %280, %279 : vector<2x32xf32>
    %282 = arith.divf %280, %281 : vector<2x32xf32>
    %283 = vector.extract_strided_slice %276 {offsets = [0, 32], sizes = [2, 32], strides = [1, 1]} : vector<2x128xf32> to vector<2x32xf32>
    %284 = arith.negf %283 : vector<2x32xf32>
    %285 = math.exp %284 : vector<2x32xf32>
    %cst_82 = arith.constant 1.000000e+00 : f32
    %286 = vector.broadcast %cst_82 : f32 to vector<2x32xf32>
    %287 = arith.addf %286, %285 : vector<2x32xf32>
    %288 = arith.divf %286, %287 : vector<2x32xf32>
    %289 = vector.extract_strided_slice %276 {offsets = [0, 64], sizes = [2, 32], strides = [1, 1]} : vector<2x128xf32> to vector<2x32xf32>
    %290 = math.tanh %289 : vector<2x32xf32>
    %291 = vector.extract_strided_slice %276 {offsets = [0, 96], sizes = [2, 32], strides = [1, 1]} : vector<2x128xf32> to vector<2x32xf32>
    %292 = arith.negf %291 : vector<2x32xf32>
    %293 = math.exp %292 : vector<2x32xf32>
    %cst_83 = arith.constant 1.000000e+00 : f32
    %294 = vector.broadcast %cst_83 : f32 to vector<2x32xf32>
    %295 = arith.addf %294, %293 : vector<2x32xf32>
    %296 = arith.divf %294, %295 : vector<2x32xf32>
    %297 = arith.mulf %288, %222 : vector<2x32xf32>
    %298 = arith.mulf %282, %290 : vector<2x32xf32>
    %299 = arith.addf %297, %298 : vector<2x32xf32>
    %300 = math.tanh %299 : vector<2x32xf32>
    %301 = arith.mulf %296, %300 : vector<2x32xf32>
    %302 = vector.extract_strided_slice %274 {offsets = [0, 0], sizes = [1, 32], strides = [1, 1]} : vector<2x32xf32> to vector<1x32xf32>
    %c0_i32_84 = arith.constant 0 : i32
    %303 = arith.addi %c0_i32_84, %c3_i32 : i32
    %304 = arith.index_cast %303 : i32 to index
    %c0_85 = arith.constant 0 : index
    %305 = vector.load %arg18[%304, %c0_85] : memref<16x64xf32, #tpu.memory_space<vmem>>, vector<1x32xf32>
    tpu.vector_store %arg18[%304, %c0_85], %302 {strides = array<i32>} : memref<16x64xf32, #tpu.memory_space<vmem>>, vector<1x32xf32>,
    %306 = vector.extract_strided_slice %301 {offsets = [0, 0], sizes = [1, 32], strides = [1, 1]} : vector<2x32xf32> to vector<1x32xf32>
    %c0_i32_86 = arith.constant 0 : i32
    %307 = arith.addi %c0_i32_86, %241 : i32
    %308 = arith.index_cast %307 : i32 to index
    %c32_87 = arith.constant 32 : index
    %309 = vector.load %arg18[%308, %c32_87] : memref<16x64xf32, #tpu.memory_space<vmem>>, vector<1x32xf32>
    tpu.vector_store %arg18[%308, %c32_87], %306 {strides = array<i32>} : memref<16x64xf32, #tpu.memory_space<vmem>>, vector<1x32xf32>,
    %310 = vector.extract_strided_slice %274 {offsets = [1, 0], sizes = [1, 32], strides = [1, 1]} : vector<2x32xf32> to vector<1x32xf32>
    %c8_i32_88 = arith.constant 8 : i32
    %311 = arith.addi %c8_i32_88, %c3_i32 : i32
    %312 = arith.index_cast %311 : i32 to index
    %c0_89 = arith.constant 0 : index
    %313 = vector.load %arg18[%312, %c0_89] : memref<16x64xf32, #tpu.memory_space<vmem>>, vector<1x32xf32>
    tpu.vector_store %arg18[%312, %c0_89], %310 {strides = array<i32>} : memref<16x64xf32, #tpu.memory_space<vmem>>, vector<1x32xf32>,
    %314 = vector.extract_strided_slice %301 {offsets = [1, 0], sizes = [1, 32], strides = [1, 1]} : vector<2x32xf32> to vector<1x32xf32>
    %c8_i32_90 = arith.constant 8 : i32
    %315 = arith.addi %c8_i32_90, %241 : i32
    %316 = arith.index_cast %315 : i32 to index
    %c32_91 = arith.constant 32 : index
    %317 = vector.load %arg18[%316, %c32_91] : memref<16x64xf32, #tpu.memory_space<vmem>>, vector<1x32xf32>
    tpu.vector_store %arg18[%316, %c32_91], %314 {strides = array<i32>} : memref<16x64xf32, #tpu.memory_space<vmem>>, vector<1x32xf32>,
    %c4_i32 = arith.constant 4 : i32
    %c7_i32_92 = arith.constant 7 : i32
    %318 = arith.subi %c7_i32_92, %c4_i32 : i32
    %c2_i32_93 = arith.constant 2 : i32
    %319 = arith.muli %c4_i32, %c2_i32_93 : i32
    %320 = arith.index_cast %319 : i32 to index
    %c0_94 = arith.constant 0 : index
    %321 = vector.load %arg17[%320, %c0_94] : memref<16x256xf32, #tpu.memory_space<vmem>>, vector<2x128xf32>
    %c2_i32_95 = arith.constant 2 : i32
    %322 = arith.muli %318, %c2_i32_95 : i32
    %323 = arith.index_cast %322 : i32 to index
    %c128_96 = arith.constant 128 : index
    %324 = vector.load %arg17[%323, %c128_96] : memref<16x256xf32, #tpu.memory_space<vmem>>, vector<2x128xf32>
    %cst_97 = arith.constant dense<0.000000e+00> : vector<2x128xf32>
    %325 = tpu.matmul %274, %7, %cst_97 {dimension_numbers = #tpu.dot_dimension_numbers<[1], [0], [0], [1], [0, 0, 1, 1], [], []>} : vector<2x32xf32>, vector<32x128xf32>, vector<2x128xf32> -> vector<2x128xf32>
    %326 = arith.addf %321, %325 : vector<2x128xf32>
    %327 = vector.extract_strided_slice %326 {offsets = [0, 0], sizes = [2, 32], strides = [1, 1]} : vector<2x128xf32> to vector<2x32xf32>
    %328 = arith.negf %327 : vector<2x32xf32>
    %329 = math.exp %328 : vector<2x32xf32>
    %cst_98 = arith.constant 1.000000e+00 : f32
    %330 = vector.broadcast %cst_98 : f32 to vector<2x32xf32>
    %331 = arith.addf %330, %329 : vector<2x32xf32>
    %332 = arith.divf %330, %331 : vector<2x32xf32>
    %333 = vector.extract_strided_slice %326 {offsets = [0, 32], sizes = [2, 32], strides = [1, 1]} : vector<2x128xf32> to vector<2x32xf32>
    %334 = arith.negf %333 : vector<2x32xf32>
    %335 = math.exp %334 : vector<2x32xf32>
    %cst_99 = arith.constant 1.000000e+00 : f32
    %336 = vector.broadcast %cst_99 : f32 to vector<2x32xf32>
    %337 = arith.addf %336, %335 : vector<2x32xf32>
    %338 = arith.divf %336, %337 : vector<2x32xf32>
    %339 = vector.extract_strided_slice %326 {offsets = [0, 64], sizes = [2, 32], strides = [1, 1]} : vector<2x128xf32> to vector<2x32xf32>
    %340 = math.tanh %339 : vector<2x32xf32>
    %341 = vector.extract_strided_slice %326 {offsets = [0, 96], sizes = [2, 32], strides = [1, 1]} : vector<2x128xf32> to vector<2x32xf32>
    %342 = arith.negf %341 : vector<2x32xf32>
    %343 = math.exp %342 : vector<2x32xf32>
    %cst_100 = arith.constant 1.000000e+00 : f32
    %344 = vector.broadcast %cst_100 : f32 to vector<2x32xf32>
    %345 = arith.addf %344, %343 : vector<2x32xf32>
    %346 = arith.divf %344, %345 : vector<2x32xf32>
    %347 = arith.mulf %338, %272 : vector<2x32xf32>
    %348 = arith.mulf %332, %340 : vector<2x32xf32>
    %349 = arith.addf %347, %348 : vector<2x32xf32>
    %350 = math.tanh %349 : vector<2x32xf32>
    %351 = arith.mulf %346, %350 : vector<2x32xf32>
    %cst_101 = arith.constant dense<0.000000e+00> : vector<2x128xf32>
    %352 = tpu.matmul %301, %8, %cst_101 {dimension_numbers = #tpu.dot_dimension_numbers<[1], [0], [0], [1], [0, 0, 1, 1], [], []>} : vector<2x32xf32>, vector<32x128xf32>, vector<2x128xf32> -> vector<2x128xf32>
    %353 = arith.addf %324, %352 : vector<2x128xf32>
    %354 = vector.extract_strided_slice %353 {offsets = [0, 0], sizes = [2, 32], strides = [1, 1]} : vector<2x128xf32> to vector<2x32xf32>
    %355 = arith.negf %354 : vector<2x32xf32>
    %356 = math.exp %355 : vector<2x32xf32>
    %cst_102 = arith.constant 1.000000e+00 : f32
    %357 = vector.broadcast %cst_102 : f32 to vector<2x32xf32>
    %358 = arith.addf %357, %356 : vector<2x32xf32>
    %359 = arith.divf %357, %358 : vector<2x32xf32>
    %360 = vector.extract_strided_slice %353 {offsets = [0, 32], sizes = [2, 32], strides = [1, 1]} : vector<2x128xf32> to vector<2x32xf32>
    %361 = arith.negf %360 : vector<2x32xf32>
    %362 = math.exp %361 : vector<2x32xf32>
    %cst_103 = arith.constant 1.000000e+00 : f32
    %363 = vector.broadcast %cst_103 : f32 to vector<2x32xf32>
    %364 = arith.addf %363, %362 : vector<2x32xf32>
    %365 = arith.divf %363, %364 : vector<2x32xf32>
    %366 = vector.extract_strided_slice %353 {offsets = [0, 64], sizes = [2, 32], strides = [1, 1]} : vector<2x128xf32> to vector<2x32xf32>
    %367 = math.tanh %366 : vector<2x32xf32>
    %368 = vector.extract_strided_slice %353 {offsets = [0, 96], sizes = [2, 32], strides = [1, 1]} : vector<2x128xf32> to vector<2x32xf32>
    %369 = arith.negf %368 : vector<2x32xf32>
    %370 = math.exp %369 : vector<2x32xf32>
    %cst_104 = arith.constant 1.000000e+00 : f32
    %371 = vector.broadcast %cst_104 : f32 to vector<2x32xf32>
    %372 = arith.addf %371, %370 : vector<2x32xf32>
    %373 = arith.divf %371, %372 : vector<2x32xf32>
    %374 = arith.mulf %365, %299 : vector<2x32xf32>
    %375 = arith.mulf %359, %367 : vector<2x32xf32>
    %376 = arith.addf %374, %375 : vector<2x32xf32>
    %377 = math.tanh %376 : vector<2x32xf32>
    %378 = arith.mulf %373, %377 : vector<2x32xf32>
    %379 = vector.extract_strided_slice %351 {offsets = [0, 0], sizes = [1, 32], strides = [1, 1]} : vector<2x32xf32> to vector<1x32xf32>
    %c0_i32_105 = arith.constant 0 : i32
    %380 = arith.addi %c0_i32_105, %c4_i32 : i32
    %381 = arith.index_cast %380 : i32 to index
    %c0_106 = arith.constant 0 : index
    %382 = vector.load %arg18[%381, %c0_106] : memref<16x64xf32, #tpu.memory_space<vmem>>, vector<1x32xf32>
    tpu.vector_store %arg18[%381, %c0_106], %379 {strides = array<i32>} : memref<16x64xf32, #tpu.memory_space<vmem>>, vector<1x32xf32>,
    %383 = vector.extract_strided_slice %378 {offsets = [0, 0], sizes = [1, 32], strides = [1, 1]} : vector<2x32xf32> to vector<1x32xf32>
    %c0_i32_107 = arith.constant 0 : i32
    %384 = arith.addi %c0_i32_107, %318 : i32
    %385 = arith.index_cast %384 : i32 to index
    %c32_108 = arith.constant 32 : index
    %386 = vector.load %arg18[%385, %c32_108] : memref<16x64xf32, #tpu.memory_space<vmem>>, vector<1x32xf32>
    tpu.vector_store %arg18[%385, %c32_108], %383 {strides = array<i32>} : memref<16x64xf32, #tpu.memory_space<vmem>>, vector<1x32xf32>,
    %387 = vector.extract_strided_slice %351 {offsets = [1, 0], sizes = [1, 32], strides = [1, 1]} : vector<2x32xf32> to vector<1x32xf32>
    %c8_i32_109 = arith.constant 8 : i32
    %388 = arith.addi %c8_i32_109, %c4_i32 : i32
    %389 = arith.index_cast %388 : i32 to index
    %c0_110 = arith.constant 0 : index
    %390 = vector.load %arg18[%389, %c0_110] : memref<16x64xf32, #tpu.memory_space<vmem>>, vector<1x32xf32>
    tpu.vector_store %arg18[%389, %c0_110], %387 {strides = array<i32>} : memref<16x64xf32, #tpu.memory_space<vmem>>, vector<1x32xf32>,
    %391 = vector.extract_strided_slice %378 {offsets = [1, 0], sizes = [1, 32], strides = [1, 1]} : vector<2x32xf32> to vector<1x32xf32>
    %c8_i32_111 = arith.constant 8 : i32
    %392 = arith.addi %c8_i32_111, %318 : i32
    %393 = arith.index_cast %392 : i32 to index
    %c32_112 = arith.constant 32 : index
    %394 = vector.load %arg18[%393, %c32_112] : memref<16x64xf32, #tpu.memory_space<vmem>>, vector<1x32xf32>
    tpu.vector_store %arg18[%393, %c32_112], %391 {strides = array<i32>} : memref<16x64xf32, #tpu.memory_space<vmem>>, vector<1x32xf32>,
    %c5_i32 = arith.constant 5 : i32
    %c7_i32_113 = arith.constant 7 : i32
    %395 = arith.subi %c7_i32_113, %c5_i32 : i32
    %c2_i32_114 = arith.constant 2 : i32
    %396 = arith.muli %c5_i32, %c2_i32_114 : i32
    %397 = arith.index_cast %396 : i32 to index
    %c0_115 = arith.constant 0 : index
    %398 = vector.load %arg17[%397, %c0_115] : memref<16x256xf32, #tpu.memory_space<vmem>>, vector<2x128xf32>
    %c2_i32_116 = arith.constant 2 : i32
    %399 = arith.muli %395, %c2_i32_116 : i32
    %400 = arith.index_cast %399 : i32 to index
    %c128_117 = arith.constant 128 : index
    %401 = vector.load %arg17[%400, %c128_117] : memref<16x256xf32, #tpu.memory_space<vmem>>, vector<2x128xf32>
    %cst_118 = arith.constant dense<0.000000e+00> : vector<2x128xf32>
    %402 = tpu.matmul %351, %7, %cst_118 {dimension_numbers = #tpu.dot_dimension_numbers<[1], [0], [0], [1], [0, 0, 1, 1], [], []>} : vector<2x32xf32>, vector<32x128xf32>, vector<2x128xf32> -> vector<2x128xf32>
    %403 = arith.addf %398, %402 : vector<2x128xf32>
    %404 = vector.extract_strided_slice %403 {offsets = [0, 0], sizes = [2, 32], strides = [1, 1]} : vector<2x128xf32> to vector<2x32xf32>
    %405 = arith.negf %404 : vector<2x32xf32>
    %406 = math.exp %405 : vector<2x32xf32>
    %cst_119 = arith.constant 1.000000e+00 : f32
    %407 = vector.broadcast %cst_119 : f32 to vector<2x32xf32>
    %408 = arith.addf %407, %406 : vector<2x32xf32>
    %409 = arith.divf %407, %408 : vector<2x32xf32>
    %410 = vector.extract_strided_slice %403 {offsets = [0, 32], sizes = [2, 32], strides = [1, 1]} : vector<2x128xf32> to vector<2x32xf32>
    %411 = arith.negf %410 : vector<2x32xf32>
    %412 = math.exp %411 : vector<2x32xf32>
    %cst_120 = arith.constant 1.000000e+00 : f32
    %413 = vector.broadcast %cst_120 : f32 to vector<2x32xf32>
    %414 = arith.addf %413, %412 : vector<2x32xf32>
    %415 = arith.divf %413, %414 : vector<2x32xf32>
    %416 = vector.extract_strided_slice %403 {offsets = [0, 64], sizes = [2, 32], strides = [1, 1]} : vector<2x128xf32> to vector<2x32xf32>
    %417 = math.tanh %416 : vector<2x32xf32>
    %418 = vector.extract_strided_slice %403 {offsets = [0, 96], sizes = [2, 32], strides = [1, 1]} : vector<2x128xf32> to vector<2x32xf32>
    %419 = arith.negf %418 : vector<2x32xf32>
    %420 = math.exp %419 : vector<2x32xf32>
    %cst_121 = arith.constant 1.000000e+00 : f32
    %421 = vector.broadcast %cst_121 : f32 to vector<2x32xf32>
    %422 = arith.addf %421, %420 : vector<2x32xf32>
    %423 = arith.divf %421, %422 : vector<2x32xf32>
    %424 = arith.mulf %415, %349 : vector<2x32xf32>
    %425 = arith.mulf %409, %417 : vector<2x32xf32>
    %426 = arith.addf %424, %425 : vector<2x32xf32>
    %427 = math.tanh %426 : vector<2x32xf32>
    %428 = arith.mulf %423, %427 : vector<2x32xf32>
    %cst_122 = arith.constant dense<0.000000e+00> : vector<2x128xf32>
    %429 = tpu.matmul %378, %8, %cst_122 {dimension_numbers = #tpu.dot_dimension_numbers<[1], [0], [0], [1], [0, 0, 1, 1], [], []>} : vector<2x32xf32>, vector<32x128xf32>, vector<2x128xf32> -> vector<2x128xf32>
    %430 = arith.addf %401, %429 : vector<2x128xf32>
    %431 = vector.extract_strided_slice %430 {offsets = [0, 0], sizes = [2, 32], strides = [1, 1]} : vector<2x128xf32> to vector<2x32xf32>
    %432 = arith.negf %431 : vector<2x32xf32>
    %433 = math.exp %432 : vector<2x32xf32>
    %cst_123 = arith.constant 1.000000e+00 : f32
    %434 = vector.broadcast %cst_123 : f32 to vector<2x32xf32>
    %435 = arith.addf %434, %433 : vector<2x32xf32>
    %436 = arith.divf %434, %435 : vector<2x32xf32>
    %437 = vector.extract_strided_slice %430 {offsets = [0, 32], sizes = [2, 32], strides = [1, 1]} : vector<2x128xf32> to vector<2x32xf32>
    %438 = arith.negf %437 : vector<2x32xf32>
    %439 = math.exp %438 : vector<2x32xf32>
    %cst_124 = arith.constant 1.000000e+00 : f32
    %440 = vector.broadcast %cst_124 : f32 to vector<2x32xf32>
    %441 = arith.addf %440, %439 : vector<2x32xf32>
    %442 = arith.divf %440, %441 : vector<2x32xf32>
    %443 = vector.extract_strided_slice %430 {offsets = [0, 64], sizes = [2, 32], strides = [1, 1]} : vector<2x128xf32> to vector<2x32xf32>
    %444 = math.tanh %443 : vector<2x32xf32>
    %445 = vector.extract_strided_slice %430 {offsets = [0, 96], sizes = [2, 32], strides = [1, 1]} : vector<2x128xf32> to vector<2x32xf32>
    %446 = arith.negf %445 : vector<2x32xf32>
    %447 = math.exp %446 : vector<2x32xf32>
    %cst_125 = arith.constant 1.000000e+00 : f32
    %448 = vector.broadcast %cst_125 : f32 to vector<2x32xf32>
    %449 = arith.addf %448, %447 : vector<2x32xf32>
    %450 = arith.divf %448, %449 : vector<2x32xf32>
    %451 = arith.mulf %442, %376 : vector<2x32xf32>
    %452 = arith.mulf %436, %444 : vector<2x32xf32>
    %453 = arith.addf %451, %452 : vector<2x32xf32>
    %454 = math.tanh %453 : vector<2x32xf32>
    %455 = arith.mulf %450, %454 : vector<2x32xf32>
    %456 = vector.extract_strided_slice %428 {offsets = [0, 0], sizes = [1, 32], strides = [1, 1]} : vector<2x32xf32> to vector<1x32xf32>
    %c0_i32_126 = arith.constant 0 : i32
    %457 = arith.addi %c0_i32_126, %c5_i32 : i32
    %458 = arith.index_cast %457 : i32 to index
    %c0_127 = arith.constant 0 : index
    %459 = vector.load %arg18[%458, %c0_127] : memref<16x64xf32, #tpu.memory_space<vmem>>, vector<1x32xf32>
    tpu.vector_store %arg18[%458, %c0_127], %456 {strides = array<i32>} : memref<16x64xf32, #tpu.memory_space<vmem>>, vector<1x32xf32>,
    %460 = vector.extract_strided_slice %455 {offsets = [0, 0], sizes = [1, 32], strides = [1, 1]} : vector<2x32xf32> to vector<1x32xf32>
    %c0_i32_128 = arith.constant 0 : i32
    %461 = arith.addi %c0_i32_128, %395 : i32
    %462 = arith.index_cast %461 : i32 to index
    %c32_129 = arith.constant 32 : index
    %463 = vector.load %arg18[%462, %c32_129] : memref<16x64xf32, #tpu.memory_space<vmem>>, vector<1x32xf32>
    tpu.vector_store %arg18[%462, %c32_129], %460 {strides = array<i32>} : memref<16x64xf32, #tpu.memory_space<vmem>>, vector<1x32xf32>,
    %464 = vector.extract_strided_slice %428 {offsets = [1, 0], sizes = [1, 32], strides = [1, 1]} : vector<2x32xf32> to vector<1x32xf32>
    %c8_i32_130 = arith.constant 8 : i32
    %465 = arith.addi %c8_i32_130, %c5_i32 : i32
    %466 = arith.index_cast %465 : i32 to index
    %c0_131 = arith.constant 0 : index
    %467 = vector.load %arg18[%466, %c0_131] : memref<16x64xf32, #tpu.memory_space<vmem>>, vector<1x32xf32>
    tpu.vector_store %arg18[%466, %c0_131], %464 {strides = array<i32>} : memref<16x64xf32, #tpu.memory_space<vmem>>, vector<1x32xf32>,
    %468 = vector.extract_strided_slice %455 {offsets = [1, 0], sizes = [1, 32], strides = [1, 1]} : vector<2x32xf32> to vector<1x32xf32>
    %c8_i32_132 = arith.constant 8 : i32
    %469 = arith.addi %c8_i32_132, %395 : i32
    %470 = arith.index_cast %469 : i32 to index
    %c32_133 = arith.constant 32 : index
    %471 = vector.load %arg18[%470, %c32_133] : memref<16x64xf32, #tpu.memory_space<vmem>>, vector<1x32xf32>
    tpu.vector_store %arg18[%470, %c32_133], %468 {strides = array<i32>} : memref<16x64xf32, #tpu.memory_space<vmem>>, vector<1x32xf32>,
    %c6_i32 = arith.constant 6 : i32
    %c7_i32_134 = arith.constant 7 : i32
    %472 = arith.subi %c7_i32_134, %c6_i32 : i32
    %c2_i32_135 = arith.constant 2 : i32
    %473 = arith.muli %c6_i32, %c2_i32_135 : i32
    %474 = arith.index_cast %473 : i32 to index
    %c0_136 = arith.constant 0 : index
    %475 = vector.load %arg17[%474, %c0_136] : memref<16x256xf32, #tpu.memory_space<vmem>>, vector<2x128xf32>
    %c2_i32_137 = arith.constant 2 : i32
    %476 = arith.muli %472, %c2_i32_137 : i32
    %477 = arith.index_cast %476 : i32 to index
    %c128_138 = arith.constant 128 : index
    %478 = vector.load %arg17[%477, %c128_138] : memref<16x256xf32, #tpu.memory_space<vmem>>, vector<2x128xf32>
    %cst_139 = arith.constant dense<0.000000e+00> : vector<2x128xf32>
    %479 = tpu.matmul %428, %7, %cst_139 {dimension_numbers = #tpu.dot_dimension_numbers<[1], [0], [0], [1], [0, 0, 1, 1], [], []>} : vector<2x32xf32>, vector<32x128xf32>, vector<2x128xf32> -> vector<2x128xf32>
    %480 = arith.addf %475, %479 : vector<2x128xf32>
    %481 = vector.extract_strided_slice %480 {offsets = [0, 0], sizes = [2, 32], strides = [1, 1]} : vector<2x128xf32> to vector<2x32xf32>
    %482 = arith.negf %481 : vector<2x32xf32>
    %483 = math.exp %482 : vector<2x32xf32>
    %cst_140 = arith.constant 1.000000e+00 : f32
    %484 = vector.broadcast %cst_140 : f32 to vector<2x32xf32>
    %485 = arith.addf %484, %483 : vector<2x32xf32>
    %486 = arith.divf %484, %485 : vector<2x32xf32>
    %487 = vector.extract_strided_slice %480 {offsets = [0, 32], sizes = [2, 32], strides = [1, 1]} : vector<2x128xf32> to vector<2x32xf32>
    %488 = arith.negf %487 : vector<2x32xf32>
    %489 = math.exp %488 : vector<2x32xf32>
    %cst_141 = arith.constant 1.000000e+00 : f32
    %490 = vector.broadcast %cst_141 : f32 to vector<2x32xf32>
    %491 = arith.addf %490, %489 : vector<2x32xf32>
    %492 = arith.divf %490, %491 : vector<2x32xf32>
    %493 = vector.extract_strided_slice %480 {offsets = [0, 64], sizes = [2, 32], strides = [1, 1]} : vector<2x128xf32> to vector<2x32xf32>
    %494 = math.tanh %493 : vector<2x32xf32>
    %495 = vector.extract_strided_slice %480 {offsets = [0, 96], sizes = [2, 32], strides = [1, 1]} : vector<2x128xf32> to vector<2x32xf32>
    %496 = arith.negf %495 : vector<2x32xf32>
    %497 = math.exp %496 : vector<2x32xf32>
    %cst_142 = arith.constant 1.000000e+00 : f32
    %498 = vector.broadcast %cst_142 : f32 to vector<2x32xf32>
    %499 = arith.addf %498, %497 : vector<2x32xf32>
    %500 = arith.divf %498, %499 : vector<2x32xf32>
    %501 = arith.mulf %492, %426 : vector<2x32xf32>
    %502 = arith.mulf %486, %494 : vector<2x32xf32>
    %503 = arith.addf %501, %502 : vector<2x32xf32>
    %504 = math.tanh %503 : vector<2x32xf32>
    %505 = arith.mulf %500, %504 : vector<2x32xf32>
    %cst_143 = arith.constant dense<0.000000e+00> : vector<2x128xf32>
    %506 = tpu.matmul %455, %8, %cst_143 {dimension_numbers = #tpu.dot_dimension_numbers<[1], [0], [0], [1], [0, 0, 1, 1], [], []>} : vector<2x32xf32>, vector<32x128xf32>, vector<2x128xf32> -> vector<2x128xf32>
    %507 = arith.addf %478, %506 : vector<2x128xf32>
    %508 = vector.extract_strided_slice %507 {offsets = [0, 0], sizes = [2, 32], strides = [1, 1]} : vector<2x128xf32> to vector<2x32xf32>
    %509 = arith.negf %508 : vector<2x32xf32>
    %510 = math.exp %509 : vector<2x32xf32>
    %cst_144 = arith.constant 1.000000e+00 : f32
    %511 = vector.broadcast %cst_144 : f32 to vector<2x32xf32>
    %512 = arith.addf %511, %510 : vector<2x32xf32>
    %513 = arith.divf %511, %512 : vector<2x32xf32>
    %514 = vector.extract_strided_slice %507 {offsets = [0, 32], sizes = [2, 32], strides = [1, 1]} : vector<2x128xf32> to vector<2x32xf32>
    %515 = arith.negf %514 : vector<2x32xf32>
    %516 = math.exp %515 : vector<2x32xf32>
    %cst_145 = arith.constant 1.000000e+00 : f32
    %517 = vector.broadcast %cst_145 : f32 to vector<2x32xf32>
    %518 = arith.addf %517, %516 : vector<2x32xf32>
    %519 = arith.divf %517, %518 : vector<2x32xf32>
    %520 = vector.extract_strided_slice %507 {offsets = [0, 64], sizes = [2, 32], strides = [1, 1]} : vector<2x128xf32> to vector<2x32xf32>
    %521 = math.tanh %520 : vector<2x32xf32>
    %522 = vector.extract_strided_slice %507 {offsets = [0, 96], sizes = [2, 32], strides = [1, 1]} : vector<2x128xf32> to vector<2x32xf32>
    %523 = arith.negf %522 : vector<2x32xf32>
    %524 = math.exp %523 : vector<2x32xf32>
    %cst_146 = arith.constant 1.000000e+00 : f32
    %525 = vector.broadcast %cst_146 : f32 to vector<2x32xf32>
    %526 = arith.addf %525, %524 : vector<2x32xf32>
    %527 = arith.divf %525, %526 : vector<2x32xf32>
    %528 = arith.mulf %519, %453 : vector<2x32xf32>
    %529 = arith.mulf %513, %521 : vector<2x32xf32>
    %530 = arith.addf %528, %529 : vector<2x32xf32>
    %531 = math.tanh %530 : vector<2x32xf32>
    %532 = arith.mulf %527, %531 : vector<2x32xf32>
    %533 = vector.extract_strided_slice %505 {offsets = [0, 0], sizes = [1, 32], strides = [1, 1]} : vector<2x32xf32> to vector<1x32xf32>
    %c0_i32_147 = arith.constant 0 : i32
    %534 = arith.addi %c0_i32_147, %c6_i32 : i32
    %535 = arith.index_cast %534 : i32 to index
    %c0_148 = arith.constant 0 : index
    %536 = vector.load %arg18[%535, %c0_148] : memref<16x64xf32, #tpu.memory_space<vmem>>, vector<1x32xf32>
    tpu.vector_store %arg18[%535, %c0_148], %533 {strides = array<i32>} : memref<16x64xf32, #tpu.memory_space<vmem>>, vector<1x32xf32>,
    %537 = vector.extract_strided_slice %532 {offsets = [0, 0], sizes = [1, 32], strides = [1, 1]} : vector<2x32xf32> to vector<1x32xf32>
    %c0_i32_149 = arith.constant 0 : i32
    %538 = arith.addi %c0_i32_149, %472 : i32
    %539 = arith.index_cast %538 : i32 to index
    %c32_150 = arith.constant 32 : index
    %540 = vector.load %arg18[%539, %c32_150] : memref<16x64xf32, #tpu.memory_space<vmem>>, vector<1x32xf32>
    tpu.vector_store %arg18[%539, %c32_150], %537 {strides = array<i32>} : memref<16x64xf32, #tpu.memory_space<vmem>>, vector<1x32xf32>,
    %541 = vector.extract_strided_slice %505 {offsets = [1, 0], sizes = [1, 32], strides = [1, 1]} : vector<2x32xf32> to vector<1x32xf32>
    %c8_i32_151 = arith.constant 8 : i32
    %542 = arith.addi %c8_i32_151, %c6_i32 : i32
    %543 = arith.index_cast %542 : i32 to index
    %c0_152 = arith.constant 0 : index
    %544 = vector.load %arg18[%543, %c0_152] : memref<16x64xf32, #tpu.memory_space<vmem>>, vector<1x32xf32>
    tpu.vector_store %arg18[%543, %c0_152], %541 {strides = array<i32>} : memref<16x64xf32, #tpu.memory_space<vmem>>, vector<1x32xf32>,
    %545 = vector.extract_strided_slice %532 {offsets = [1, 0], sizes = [1, 32], strides = [1, 1]} : vector<2x32xf32> to vector<1x32xf32>
    %c8_i32_153 = arith.constant 8 : i32
    %546 = arith.addi %c8_i32_153, %472 : i32
    %547 = arith.index_cast %546 : i32 to index
    %c32_154 = arith.constant 32 : index
    %548 = vector.load %arg18[%547, %c32_154] : memref<16x64xf32, #tpu.memory_space<vmem>>, vector<1x32xf32>
    tpu.vector_store %arg18[%547, %c32_154], %545 {strides = array<i32>} : memref<16x64xf32, #tpu.memory_space<vmem>>, vector<1x32xf32>,
    %c7_i32_155 = arith.constant 7 : i32
    %c7_i32_156 = arith.constant 7 : i32
    %549 = arith.subi %c7_i32_156, %c7_i32_155 : i32
    %c2_i32_157 = arith.constant 2 : i32
    %550 = arith.muli %c7_i32_155, %c2_i32_157 : i32
    %551 = arith.index_cast %550 : i32 to index
    %c0_158 = arith.constant 0 : index
    %552 = vector.load %arg17[%551, %c0_158] : memref<16x256xf32, #tpu.memory_space<vmem>>, vector<2x128xf32>
    %c2_i32_159 = arith.constant 2 : i32
    %553 = arith.muli %549, %c2_i32_159 : i32
    %554 = arith.index_cast %553 : i32 to index
    %c128_160 = arith.constant 128 : index
    %555 = vector.load %arg17[%554, %c128_160] : memref<16x256xf32, #tpu.memory_space<vmem>>, vector<2x128xf32>
    %cst_161 = arith.constant dense<0.000000e+00> : vector<2x128xf32>
    %556 = tpu.matmul %505, %7, %cst_161 {dimension_numbers = #tpu.dot_dimension_numbers<[1], [0], [0], [1], [0, 0, 1, 1], [], []>} : vector<2x32xf32>, vector<32x128xf32>, vector<2x128xf32> -> vector<2x128xf32>
    %557 = arith.addf %552, %556 : vector<2x128xf32>
    %558 = vector.extract_strided_slice %557 {offsets = [0, 0], sizes = [2, 32], strides = [1, 1]} : vector<2x128xf32> to vector<2x32xf32>
    %559 = arith.negf %558 : vector<2x32xf32>
    %560 = math.exp %559 : vector<2x32xf32>
    %cst_162 = arith.constant 1.000000e+00 : f32
    %561 = vector.broadcast %cst_162 : f32 to vector<2x32xf32>
    %562 = arith.addf %561, %560 : vector<2x32xf32>
    %563 = arith.divf %561, %562 : vector<2x32xf32>
    %564 = vector.extract_strided_slice %557 {offsets = [0, 32], sizes = [2, 32], strides = [1, 1]} : vector<2x128xf32> to vector<2x32xf32>
    %565 = arith.negf %564 : vector<2x32xf32>
    %566 = math.exp %565 : vector<2x32xf32>
    %cst_163 = arith.constant 1.000000e+00 : f32
    %567 = vector.broadcast %cst_163 : f32 to vector<2x32xf32>
    %568 = arith.addf %567, %566 : vector<2x32xf32>
    %569 = arith.divf %567, %568 : vector<2x32xf32>
    %570 = vector.extract_strided_slice %557 {offsets = [0, 64], sizes = [2, 32], strides = [1, 1]} : vector<2x128xf32> to vector<2x32xf32>
    %571 = math.tanh %570 : vector<2x32xf32>
    %572 = vector.extract_strided_slice %557 {offsets = [0, 96], sizes = [2, 32], strides = [1, 1]} : vector<2x128xf32> to vector<2x32xf32>
    %573 = arith.negf %572 : vector<2x32xf32>
    %574 = math.exp %573 : vector<2x32xf32>
    %cst_164 = arith.constant 1.000000e+00 : f32
    %575 = vector.broadcast %cst_164 : f32 to vector<2x32xf32>
    %576 = arith.addf %575, %574 : vector<2x32xf32>
    %577 = arith.divf %575, %576 : vector<2x32xf32>
    %578 = arith.mulf %569, %503 : vector<2x32xf32>
    %579 = arith.mulf %563, %571 : vector<2x32xf32>
    %580 = arith.addf %578, %579 : vector<2x32xf32>
    %581 = math.tanh %580 : vector<2x32xf32>
    %582 = arith.mulf %577, %581 : vector<2x32xf32>
    %cst_165 = arith.constant dense<0.000000e+00> : vector<2x128xf32>
    %583 = tpu.matmul %532, %8, %cst_165 {dimension_numbers = #tpu.dot_dimension_numbers<[1], [0], [0], [1], [0, 0, 1, 1], [], []>} : vector<2x32xf32>, vector<32x128xf32>, vector<2x128xf32> -> vector<2x128xf32>
    %584 = arith.addf %555, %583 : vector<2x128xf32>
    %585 = vector.extract_strided_slice %584 {offsets = [0, 0], sizes = [2, 32], strides = [1, 1]} : vector<2x128xf32> to vector<2x32xf32>
    %586 = arith.negf %585 : vector<2x32xf32>
    %587 = math.exp %586 : vector<2x32xf32>
    %cst_166 = arith.constant 1.000000e+00 : f32
    %588 = vector.broadcast %cst_166 : f32 to vector<2x32xf32>
    %589 = arith.addf %588, %587 : vector<2x32xf32>
    %590 = arith.divf %588, %589 : vector<2x32xf32>
    %591 = vector.extract_strided_slice %584 {offsets = [0, 32], sizes = [2, 32], strides = [1, 1]} : vector<2x128xf32> to vector<2x32xf32>
    %592 = arith.negf %591 : vector<2x32xf32>
    %593 = math.exp %592 : vector<2x32xf32>
    %cst_167 = arith.constant 1.000000e+00 : f32
    %594 = vector.broadcast %cst_167 : f32 to vector<2x32xf32>
    %595 = arith.addf %594, %593 : vector<2x32xf32>
    %596 = arith.divf %594, %595 : vector<2x32xf32>
    %597 = vector.extract_strided_slice %584 {offsets = [0, 64], sizes = [2, 32], strides = [1, 1]} : vector<2x128xf32> to vector<2x32xf32>
    %598 = math.tanh %597 : vector<2x32xf32>
    %599 = vector.extract_strided_slice %584 {offsets = [0, 96], sizes = [2, 32], strides = [1, 1]} : vector<2x128xf32> to vector<2x32xf32>
    %600 = arith.negf %599 : vector<2x32xf32>
    %601 = math.exp %600 : vector<2x32xf32>
    %cst_168 = arith.constant 1.000000e+00 : f32
    %602 = vector.broadcast %cst_168 : f32 to vector<2x32xf32>
    %603 = arith.addf %602, %601 : vector<2x32xf32>
    %604 = arith.divf %602, %603 : vector<2x32xf32>
    %605 = arith.mulf %596, %530 : vector<2x32xf32>
    %606 = arith.mulf %590, %598 : vector<2x32xf32>
    %607 = arith.addf %605, %606 : vector<2x32xf32>
    %608 = math.tanh %607 : vector<2x32xf32>
    %609 = arith.mulf %604, %608 : vector<2x32xf32>
    %610 = vector.extract_strided_slice %582 {offsets = [0, 0], sizes = [1, 32], strides = [1, 1]} : vector<2x32xf32> to vector<1x32xf32>
    %c0_i32_169 = arith.constant 0 : i32
    %611 = arith.addi %c0_i32_169, %c7_i32_155 : i32
    %612 = arith.index_cast %611 : i32 to index
    %c0_170 = arith.constant 0 : index
    %613 = vector.load %arg18[%612, %c0_170] : memref<16x64xf32, #tpu.memory_space<vmem>>, vector<1x32xf32>
    tpu.vector_store %arg18[%612, %c0_170], %610 {strides = array<i32>} : memref<16x64xf32, #tpu.memory_space<vmem>>, vector<1x32xf32>,
    %614 = vector.extract_strided_slice %609 {offsets = [0, 0], sizes = [1, 32], strides = [1, 1]} : vector<2x32xf32> to vector<1x32xf32>
    %c0_i32_171 = arith.constant 0 : i32
    %615 = arith.addi %c0_i32_171, %549 : i32
    %616 = arith.index_cast %615 : i32 to index
    %c32_172 = arith.constant 32 : index
    %617 = vector.load %arg18[%616, %c32_172] : memref<16x64xf32, #tpu.memory_space<vmem>>, vector<1x32xf32>
    tpu.vector_store %arg18[%616, %c32_172], %614 {strides = array<i32>} : memref<16x64xf32, #tpu.memory_space<vmem>>, vector<1x32xf32>,
    %618 = vector.extract_strided_slice %582 {offsets = [1, 0], sizes = [1, 32], strides = [1, 1]} : vector<2x32xf32> to vector<1x32xf32>
    %c8_i32_173 = arith.constant 8 : i32
    %619 = arith.addi %c8_i32_173, %c7_i32_155 : i32
    %620 = arith.index_cast %619 : i32 to index
    %c0_174 = arith.constant 0 : index
    %621 = vector.load %arg18[%620, %c0_174] : memref<16x64xf32, #tpu.memory_space<vmem>>, vector<1x32xf32>
    tpu.vector_store %arg18[%620, %c0_174], %618 {strides = array<i32>} : memref<16x64xf32, #tpu.memory_space<vmem>>, vector<1x32xf32>,
    %622 = vector.extract_strided_slice %609 {offsets = [1, 0], sizes = [1, 32], strides = [1, 1]} : vector<2x32xf32> to vector<1x32xf32>
    %c8_i32_175 = arith.constant 8 : i32
    %623 = arith.addi %c8_i32_175, %549 : i32
    %624 = arith.index_cast %623 : i32 to index
    %c32_176 = arith.constant 32 : index
    %625 = vector.load %arg18[%624, %c32_176] : memref<16x64xf32, #tpu.memory_space<vmem>>, vector<1x32xf32>
    tpu.vector_store %arg18[%624, %c32_176], %622 {strides = array<i32>} : memref<16x64xf32, #tpu.memory_space<vmem>>, vector<1x32xf32>,
    %c8_i32_177 = arith.constant 8 : i32
    %c0_178 = arith.constant 0 : index
    %c0_179 = arith.constant 0 : index
    %626 = vector.load %arg18[%c0_178, %c0_179] : memref<16x64xf32, #tpu.memory_space<vmem>>, vector<16x64xf32>
    %c0_180 = arith.constant 0 : index
    %c0_181 = arith.constant 0 : index
    %627 = vector.load %arg6[%c0_180, %c0_181] : memref<64x192xf32, #tpu.memory_space<vmem>>, vector<64x192xf32>
    %cst_182 = arith.constant dense<0.000000e+00> : vector<16x192xf32>
    %628 = tpu.matmul %626, %627, %cst_182 {dimension_numbers = #tpu.dot_dimension_numbers<[1], [0], [0], [1], [0, 0, 1, 1], [], []>} : vector<16x64xf32>, vector<64x192xf32>, vector<16x192xf32> -> vector<16x192xf32>
    %c0_183 = arith.constant 0 : index
    %c0_184 = arith.constant 0 : index
    %629 = vector.load %arg7[%c0_183, %c0_184] : memref<1x192xf32, #tpu.memory_space<vmem>>, vector<1x192xf32>
    %630 = vector.broadcast %629 : vector<1x192xf32> to vector<16x192xf32>
    %631 = arith.addf %628, %630 : vector<16x192xf32>
    %632 = vector.shape_cast %631 : vector<16x192xf32> to vector<2x8x192xf32>
    %633 = vector.extract_strided_slice %632 {offsets = [0, 0, 0], sizes = [2, 8, 64], strides = [1, 1, 1]} : vector<2x8x192xf32> to vector<2x8x64xf32>
    %cst_185 = arith.constant 1.250000e-01 : f32
    %634 = vector.broadcast %cst_185 : f32 to vector<2x8x64xf32>
    %635 = arith.mulf %633, %634 : vector<2x8x64xf32>
    %636 = vector.extract_strided_slice %632 {offsets = [0, 0, 64], sizes = [2, 8, 64], strides = [1, 1, 1]} : vector<2x8x192xf32> to vector<2x8x64xf32>
    %637 = vector.extract_strided_slice %632 {offsets = [0, 0, 128], sizes = [2, 8, 64], strides = [1, 1, 1]} : vector<2x8x192xf32> to vector<2x8x64xf32>
    "tpu.trace_start"() <{level = 10 : i32, message = "bqd,bkd->bqk"}> : () -> ()
    %cst_186 = arith.constant dense<0.000000e+00> : vector<2x8x8xf32>
    %638 = tpu.matmul %635, %636, %cst_186 {dimension_numbers = #tpu.dot_dimension_numbers<[2], [2], [1], [1], [0, 0, 0, 1, 1, 1], [0], [0]>} : vector<2x8x64xf32>, vector<2x8x64xf32>, vector<2x8x8xf32> -> vector<2x8x8xf32>
    "tpu.trace_stop"() : () -> ()
    %c0_187 = arith.constant 0 : index
    %c0_188 = arith.constant 0 : index
    %c0_189 = arith.constant 0 : index
    %639 = vector.load %arg1[%c0_187, %c0_188, %c0_189] : memref<2x1x8xf32, #tpu.memory_space<vmem>>, vector<2x1x8xf32>
    %cst_190 = arith.constant 5.000000e-01 : f32
    %640 = vector.broadcast %cst_190 : f32 to vector<2x1x8xf32>
    %641 = arith.cmpf ogt, %639, %640 : vector<2x1x8xf32>
    %cst_191 = arith.constant -1.000000e+30 : f32
    %642 = vector.shape_cast %641 : vector<2x1x8xi1> to vector<2x1x8xi1>
    %643 = vector.broadcast %642 : vector<2x1x8xi1> to vector<2x8x8xi1>
    %644 = vector.broadcast %cst_191 : f32 to vector<2x8x8xf32>
    %645 = arith.select %643, %644, %638 : vector<2x8x8xi1>, vector<2x8x8xf32>
    %cst_192 = arith.constant dense<0xFF800000> : vector<2x8xf32>
    %646 = vector.multi_reduction <maximumf>, %645, %cst_192 [2] : vector<2x8x8xf32> to vector<2x8xf32>
    %647 = vector.shape_cast %646 : vector<2x8xf32> to vector<2x8x1xf32>
    %648 = vector.broadcast %647 : vector<2x8x1xf32> to vector<2x8x8xf32>
    %649 = arith.subf %645, %648 : vector<2x8x8xf32>
    %650 = math.exp %649 : vector<2x8x8xf32>
    %cst_193 = arith.constant dense<0.000000e+00> : vector<2x8xf32>
    %651 = vector.multi_reduction <add>, %650, %cst_193 [2] : vector<2x8x8xf32> to vector<2x8xf32>
    %652 = vector.shape_cast %651 : vector<2x8xf32> to vector<2x8x1xf32>
    %653 = tpu.reciprocal %652 {approx = true} : vector<2x8x1xf32> -> vector<2x8x1xf32>
    %654 = vector.broadcast %653 : vector<2x8x1xf32> to vector<2x8x8xf32>
    %655 = arith.mulf %650, %654 : vector<2x8x8xf32>
    %cst_194 = arith.constant dense<0.000000e+00> : vector<2x8xf32>
    %656 = vector.multi_reduction <add>, %655, %cst_194 [1] : vector<2x8x8xf32> to vector<2x8xf32>
    %657 = vector.shape_cast %656 : vector<2x8xf32> to vector<2x1x8xf32>
    %cst_195 = arith.constant 8.000000e+00 : f32
    %658 = vector.broadcast %cst_195 : f32 to vector<2x1x8xf32>
    %659 = arith.divf %657, %658 : vector<2x1x8xf32>
    "tpu.trace_start"() <{level = 10 : i32, message = "bqk,bkd->bqd"}> : () -> ()
    %cst_196 = arith.constant dense<0.000000e+00> : vector<2x1x64xf32>
    %660 = tpu.matmul %659, %637, %cst_196 {dimension_numbers = #tpu.dot_dimension_numbers<[2], [1], [1], [2], [0, 0, 0, 1, 1, 2], [0], [0]>} : vector<2x1x8xf32>, vector<2x8x64xf32>, vector<2x1x64xf32> -> vector<2x1x64xf32>
    "tpu.trace_stop"() : () -> ()
    %661 = vector.shape_cast %660 : vector<2x1x64xf32> to vector<2x64xf32>
    %c0_197 = arith.constant 0 : index
    %c0_198 = arith.constant 0 : index
    %662 = vector.load %arg8[%c0_197, %c0_198] : memref<64x64xf32, #tpu.memory_space<vmem>>, vector<64x64xf32>
    %cst_199 = arith.constant dense<0.000000e+00> : vector<2x64xf32>
    %663 = tpu.matmul %661, %662, %cst_199 {dimension_numbers = #tpu.dot_dimension_numbers<[1], [0], [0], [1], [0, 0, 1, 1], [], []>} : vector<2x64xf32>, vector<64x64xf32>, vector<2x64xf32> -> vector<2x64xf32>
    %c0_200 = arith.constant 0 : index
    %c0_201 = arith.constant 0 : index
    %664 = vector.load %arg9[%c0_200, %c0_201] : memref<1x64xf32, #tpu.memory_space<vmem>>, vector<1x64xf32>
    %665 = vector.broadcast %664 : vector<1x64xf32> to vector<2x64xf32>
    %666 = arith.addf %663, %665 : vector<2x64xf32>
    %c0_202 = arith.constant 0 : index
    %c0_203 = arith.constant 0 : index
    %667 = vector.load %arg12[%c0_202, %c0_203] : memref<1x64xf32, #tpu.memory_space<vmem>>, vector<1x64xf32>
    %668 = vector.broadcast %667 : vector<1x64xf32> to vector<2x64xf32>
    %669 = arith.subf %666, %668 : vector<2x64xf32>
    %c0_204 = arith.constant 0 : index
    %c0_205 = arith.constant 0 : index
    %670 = vector.load %arg13[%c0_204, %c0_205] : memref<1x64xf32, #tpu.memory_space<vmem>>, vector<1x64xf32>
    %cst_206 = arith.constant 9.99999974E-6 : f32
    %671 = vector.broadcast %cst_206 : f32 to vector<1x64xf32>
    %672 = arith.addf %670, %671 : vector<1x64xf32>
    %673 = math.rsqrt %672 : vector<1x64xf32>
    %674 = vector.broadcast %673 : vector<1x64xf32> to vector<2x64xf32>
    %675 = arith.mulf %669, %674 : vector<2x64xf32>
    %c0_207 = arith.constant 0 : index
    %c0_208 = arith.constant 0 : index
    %676 = vector.load %arg10[%c0_207, %c0_208] : memref<1x64xf32, #tpu.memory_space<vmem>>, vector<1x64xf32>
    %677 = vector.broadcast %676 : vector<1x64xf32> to vector<2x64xf32>
    %678 = arith.mulf %675, %677 : vector<2x64xf32>
    %c0_209 = arith.constant 0 : index
    %c0_210 = arith.constant 0 : index
    %679 = vector.load %arg11[%c0_209, %c0_210] : memref<1x64xf32, #tpu.memory_space<vmem>>, vector<1x64xf32>
    %680 = vector.broadcast %679 : vector<1x64xf32> to vector<2x64xf32>
    %681 = arith.addf %678, %680 : vector<2x64xf32>
    %c0_211 = arith.constant 0 : index
    %c0_212 = arith.constant 0 : index
    %682 = vector.load %arg14[%c0_211, %c0_212] : memref<64x4xf32, #tpu.memory_space<vmem>>, vector<64x4xf32>
    %cst_213 = arith.constant dense<0.000000e+00> : vector<2x4xf32>
    %683 = tpu.matmul %681, %682, %cst_213 {dimension_numbers = #tpu.dot_dimension_numbers<[1], [0], [0], [1], [0, 0, 1, 1], [], []>} : vector<2x64xf32>, vector<64x4xf32>, vector<2x4xf32> -> vector<2x4xf32>
    %c0_214 = arith.constant 0 : index
    %c0_215 = arith.constant 0 : index
    %684 = vector.load %arg15[%c0_214, %c0_215] : memref<1x4xf32, #tpu.memory_space<vmem>>, vector<1x4xf32>
    %685 = vector.broadcast %684 : vector<1x4xf32> to vector<2x4xf32>
    %686 = arith.addf %683, %685 : vector<2x4xf32>
    %c0_216 = arith.constant 0 : index
    %c0_217 = arith.constant 0 : index
    %687 = vector.load %arg16[%c0_216, %c0_217] : memref<2x4xf32, #tpu.memory_space<vmem>>, vector<2x4xf32>
    tpu.vector_store %arg16[%c0_216, %c0_217], %686 {strides = array<i32>} : memref<2x4xf32, #tpu.memory_space<vmem>>, vector<2x4xf32>,
    return
  }
}

</mosaic_0001>

<bundles_post_ra>
// kernel: tc_base_forward.1
= control target key start
LH: loop header
LB: loop body
LE: loop exit
PB: predicated region body
PF: predicated region fallthrough
CT: control target
= control target key end

     0   :  { %s4359_s0 = inlined_call_operand.vmem [shape: f32[16,16], index: 0, kind: input, shape index: {}]   ;;  %s4360_s1 = inlined_call_operand.vmem [shape: f32[2,1,8], index: 1, kind: input, shape index: {}]   ;;  %s4361_s2 = inlined_call_operand.vmem [shape: f32[16,256], index: 2, kind: input, shape index: {}]   ;;  %s4362_s3 = inlined_call_operand.hbm [shape: f32[32,128], index: 3, kind: input, shape index: {}]   ;;  %s4363_s4 = inlined_call_operand.hbm [shape: f32[32,128], index: 4, kind: input, shape index: {}]   ;;  %s4364_s5 = inlined_call_operand.vmem [shape: f32[1,256], index: 5, kind: input, shape index: {}]   ;;  %s4365_s6 = inlined_call_operand.vmem [shape: f32[64,192], index: 6, kind: input, shape index: {}]   ;;  %s4366_s7 = inlined_call_operand.vmem [shape: f32[1,192], index: 7, kind: input, shape index: {}]   ;;  %s4367_s8 = inlined_call_operand.hbm [shape: f32[64,64], index: 8, kind: input, shape index: {}]   ;;  %s4368_s9 = inlined_call_operand.vmem [shape: f32[1,64], index: 9, kind: input, shape index: {}]   ;;  %s4369_s10 = inlined_call_operand.vmem [shape: f32[1,64], index: 10, kind: input, shape index: {}]   ;;  %s4370_s11 = inlined_call_operand.hbm [shape: f32[1,64], index: 11, kind: input, shape index: {}]   ;;  %s4371_s12 = inlined_call_operand.hbm [shape: f32[1,64], index: 12, kind: input, shape index: {}]   ;;  %s4372_s13 = inlined_call_operand.hbm [shape: f32[1,64], index: 13, kind: input, shape index: {}]   ;;  %s4373_s14 = inlined_call_operand.vmem [shape: f32[64,4], index: 14, kind: input, shape index: {}]   ;;  %s4374_s15 = inlined_call_operand.hbm [shape: f32[1,4], index: 15, kind: input, shape index: {}]   ;;  %s4375_s16 = inlined_call_operand.hbm [shape: f32[2,4], index: 16, kind: output, shape index: {}]  }
   0x1   :  { %4379 = sst [smem:[#allocation22_spill]] %s4359_s0 }
   0x2   :  { %21 = vsyncpa [#allocation5], 0 }
   0x3   :  { %22 = vsyncpa [#allocation8], 0 }
   0x4   :  { %23 = vsyncpa [#allocation11], 0 }
   0x5   :  { %24 = vsyncpa [#allocation14], 0 }
   0x6   :  { %25 = vsyncpa [#allocation6], 0  ;;  %s3625_s21 = smov [#allocation7]   ;;  %s3626_s23 = smov [#allocation10]  }
   0x7   :  { %s49_s22 = sshll.u32 %s3625_s21, 4  ;;  %s84_s24 = sshll.u32 %s3626_s23, 4  ;;  %s50_s22 = int_to_ptr.vmem [resolvable:$true] %s49_s22  ;;  %s3726_s24 = int_to_ptr.vmem [resolvable:$true] %s84_s24 }
   0x8   :  { %s3439_s27 = scalar_lea.hbm %s4363_s4, 512 }
   0x9   :  { %p3440_p0 = scmp.ne.s32.totalorder %s4363_s4, %s3439_s27  ;;  %p3443_p1 = scmp.lt.u32.totalorder %s3439_s27, %s4363_s4 }
   0xb   :  { %p3445_p2 = pnand %p3443_p1, %p3440_p0 }
   0xd   :  { %3448 = shalt.err (!%p3445_p2)
}
   0xe   :  { %s3449_s17 = scalar_lea.vmem %s50_s22, 512  ;;  %p3454_p4 = scmp.lt.s32.totalorder %s50_s22, %s50_s22 }
   0xf   :  { %p3450_p3 = scmp.ne.s32.totalorder %s50_s22, %s3449_s17  ;;  %p3455_p5 = scmp.lt.s32.totalorder %s3449_s17, %s3449_s17 }
  0x11   :  { %p3456_p6 = por %p3455_p5, %p3454_p4 }
  0x13   :  { %p3457_p7 = pnand %p3456_p6, %p3450_p3 }
  0x15   :  { %3460 = shalt.err (!%p3457_p7)
}
  0x16   :  { %s3627_s18 = smov 128   ;;  %s3628_s19 = smov 8  }
  0x17   :  { %55 = dma.hbm_to_vmem [thread:$0]  %s4363_s4, 512, %s50_s22, [#allocation8], %s3627_s18, %s3627_s18, %s3628_s19  }
  0x18   :  { %s3461_s26 = scalar_lea.hbm %s4370_s11, 16 }
  0x19   :  { %p3462_p8 = scmp.ne.s32.totalorder %s4370_s11, %s3461_s26  ;;  %p3465_p9 = scmp.lt.u32.totalorder %s3461_s26, %s4370_s11 }
  0x1b   :  { %p3467_p10 = pnand %p3465_p9, %p3462_p8 }
  0x1d   :  { %3470 = shalt.err (!%p3467_p10)
}
  0x1e   :  { %s3471_s0 = scalar_lea.vmem %s3726_s24, 16  ;;  %s3475_s4 = scalar_lea.vmem %s3726_s24, 32 }
  0x1f   :  { %p3472_p11 = scmp.ne.s32.totalorder %s3726_s24, %s3471_s0  ;;  %p3476_p12 = scmp.lt.s32.totalorder %s3726_s24, %s3726_s24 }
  0x20   :  { %p3477_p13 = scmp.lt.s32.totalorder %s3475_s4, %s3471_s0 }
  0x22   :  { %p3478_p0 = por %p3477_p13, %p3476_p12 }
  0x24   :  { %p3479_p1 = pnand %p3478_p0, %p3472_p11 }
  0x26   :  { %3482 = shalt.err (!%p3479_p1)
}
  0x27   :  { %87 = dma.hbm_to_vmem [thread:$0]  %s4370_s11, 16, %s3726_s24, [#allocation11]  }
  0x28   :  { %s3629_s20 = smov [#allocation13]   ;;  %s3630_s23 = smov [#allocation4]  }
  0x29   :  { %s104_s21 = sshll.u32 %s3629_s20, 4  ;;  %s37_s25 = sshll.u32 %s3630_s23, 4  ;;  %s105_s21 = int_to_ptr.vmem [resolvable:$true] %s104_s21  ;;  %s3761_s25 = int_to_ptr.vmem [resolvable:$true] %s37_s25 }
  0x2a   :  { %s3483_s28 = scalar_lea.hbm %s4372_s13, 16 }
  0x2b   :  { %p3484_p2 = scmp.ne.s32.totalorder %s4372_s13, %s3483_s28  ;;  %p3487_p3 = scmp.lt.u32.totalorder %s3483_s28, %s4372_s13 }
  0x2d   :  { %p3489_p4 = pnand %p3487_p3, %p3484_p2 }
  0x2f   :  { %3492 = shalt.err (!%p3489_p4)
}
  0x30   :  { %s3493_s11 = scalar_lea.vmem %s105_s21, 16  ;;  %s3497_s24 = scalar_lea.vmem %s105_s21, 32 }
  0x31   :  { %p3494_p5 = scmp.ne.s32.totalorder %s105_s21, %s3493_s11  ;;  %p3498_p6 = scmp.lt.s32.totalorder %s105_s21, %s105_s21 }
  0x32   :  { %p3499_p7 = scmp.lt.s32.totalorder %s3497_s24, %s3493_s11 }
  0x34   :  { %p3500_p8 = por %p3499_p7, %p3498_p6 }
  0x36   :  { %p3501_p9 = pnand %p3500_p8, %p3494_p5 }
  0x38   :  { %3504 = shalt.err (!%p3501_p9)
}
  0x39   :  { %107 = dma.hbm_to_vmem [thread:$0]  %s4372_s13, 16, %s105_s21, [#allocation14]  }
  0x3a   :  { %s3505_s26 = scalar_lea.hbm %s4362_s3, 512 }
  0x3b   :  { %p3506_p10 = scmp.ne.s32.totalorder %s4362_s3, %s3505_s26  ;;  %p3509_p11 = scmp.lt.u32.totalorder %s3505_s26, %s4362_s3 }
  0x3d   :  { %p3511_p12 = pnand %p3509_p11, %p3506_p10 }
  0x3f   :  { %3514 = shalt.err (!%p3511_p12)
}
  0x40   :  { %s3515_s0 = scalar_lea.vmem %s3761_s25, 512  ;;  %p3520_p0 = scmp.lt.s32.totalorder %s3761_s25, %s3761_s25 }
  0x41   :  { %p3516_p13 = scmp.ne.s32.totalorder %s3761_s25, %s3515_s0  ;;  %p3521_p1 = scmp.lt.s32.totalorder %s3515_s0, %s3515_s0 }
  0x43   :  { %p3522_p2 = por %p3521_p1, %p3520_p0 }
  0x45   :  { %p3523_p3 = pnand %p3522_p2, %p3516_p13 }
  0x47   :  { %3526 = shalt.err (!%p3523_p3)
}
  0x48   :  { %43 = dma.hbm_to_vmem [thread:$0]  %s4362_s3, 512, %s3761_s25, [#allocation5], %s3627_s18, %s3627_s18, %s3628_s19  }
  0x49   :  { %s3631_s4 = smov [#allocation9]   ;;  %s3632_s24 = smov [#allocation12]  }
  0x4a   :  { %s67_s11 = sshll.u32 %s3631_s4, 4  ;;  %s94_s22 = sshll.u32 %s3632_s24, 4  ;;  %s68_s11 = int_to_ptr.vmem [resolvable:$true] %s67_s11  ;;  %s95_s22 = int_to_ptr.vmem [resolvable:$true] %s94_s22 }
  0x4b   :  { %s3527_s23 = scalar_lea.hbm %s4367_s8, 1024 }
  0x4c   :  { %p3528_p4 = scmp.ne.s32.totalorder %s4367_s8, %s3527_s23  ;;  %p3531_p5 = scmp.lt.u32.totalorder %s3527_s23, %s4367_s8 }
  0x4e   :  { %p3533_p6 = pnand %p3531_p5, %p3528_p4 }
  0x50   :  { %3536 = shalt.err (!%p3533_p6)
}
  0x51   :  { %s3537_s3 = scalar_lea.vmem %s68_s11, 1024  ;;  %p3542_p8 = scmp.lt.s32.totalorder %s68_s11, %s68_s11 }
  0x52   :  { %p3538_p7 = scmp.ne.s32.totalorder %s68_s11, %s3537_s3  ;;  %p3543_p9 = scmp.lt.s32.totalorder %s3537_s3, %s3537_s3 }
  0x54   :  { %p3544_p10 = por %p3543_p9, %p3542_p8 }
  0x56   :  { %p3545_p11 = pnand %p3544_p10, %p3538_p7 }
  0x58   :  { %3548 = shalt.err (!%p3545_p11)
}
  0x59   :  { %73 = dma.hbm_to_vmem [thread:$0]  %s4367_s8, 1024, %s68_s11, [#allocation8], %s3627_s18, %s3627_s18, %s3628_s19  }
  0x5a   :  { %s3549_s21 = scalar_lea.hbm %s4371_s12, 16 }
  0x5b   :  { %p3550_p12 = scmp.ne.s32.totalorder %s4371_s12, %s3549_s21  ;;  %p3553_p13 = scmp.lt.u32.totalorder %s3549_s21, %s4371_s12 }
  0x5d   :  { %p3555_p0 = pnand %p3553_p13, %p3550_p12 }
  0x5f   :  { %3558 = shalt.err (!%p3555_p0)
}
  0x60   :  { %s3559_s23 = scalar_lea.vmem %s95_s22, 16  ;;  %s3563_s26 = scalar_lea.vmem %s95_s22, 32 }
  0x61   :  { %p3560_p1 = scmp.ne.s32.totalorder %s95_s22, %s3559_s23  ;;  %p3564_p2 = scmp.lt.s32.totalorder %s95_s22, %s95_s22 }
  0x62   :  { %p3565_p3 = scmp.lt.s32.totalorder %s3563_s26, %s3559_s23 }
  0x64   :  { %p3566_p4 = por %p3565_p3, %p3564_p2 }
  0x66   :  { %p3567_p5 = pnand %p3566_p4, %p3560_p1 }
  0x68   :  { %3570 = shalt.err (!%p3567_p5)
}
  0x69   :  { %97 = dma.hbm_to_vmem [thread:$0]  %s4371_s12, 16, %s95_s22, [#allocation11]  }
  0x6a   :  { %s3633_s19 = smov [#allocation15]   ;;  %s3571_s29 = scalar_lea.hbm %s4374_s15, 16 }
  0x6b   :  { %s116_s11 = sshll.u32 %s3633_s19, 4  ;;  %p3572_p6 = scmp.ne.s32.totalorder %s4374_s15, %s3571_s29  ;;  %s117_s11 = int_to_ptr.vmem [resolvable:$true] %s116_s11 }
  0x6c   :  { %p3575_p7 = scmp.lt.u32.totalorder %s3571_s29, %s4374_s15 }
  0x6e   :  { %p3577_p8 = pnand %p3575_p7, %p3572_p6 }
  0x70   :  { %3580 = shalt.err (!%p3577_p8)
}
  0x71   :  { %s3581_s13 = scalar_lea.vmem %s117_s11, 16  ;;  %s3585_s12 = scalar_lea.vmem %s117_s11, 32 }
  0x72   :  { %p3582_p9 = scmp.ne.s32.totalorder %s117_s11, %s3581_s13  ;;  %p3586_p10 = scmp.lt.s32.totalorder %s117_s11, %s117_s11 }
  0x73   :  { %p3587_p11 = scmp.lt.s32.totalorder %s3585_s12, %s3581_s13 }
  0x75   :  { %p3588_p12 = por %p3587_p11, %p3586_p10 }
  0x77   :  { %p3589_p13 = pnand %p3588_p12, %p3582_p9 }
  0x79   :  { %3592 = shalt.err (!%p3589_p13)
}
  0x7a   :  { %119 = dma.hbm_to_vmem [thread:$0]  %s4374_s15, 16, %s117_s11, [#allocation14]  }
  0x7b   :  { %3615 = dma.done.wait [#allocation5], 512  }
  0x7c   :  { %3616 = vsyncadd [#allocation5], 4294966784 }
  0x7d   :  { %3617 = dma.done.wait [#allocation8], 1536  }
  0x7e   :  { %3618 = vsyncadd [#allocation8], 4294965760 }
  0x7f   :  { %3619 = dma.done.wait [#allocation11], 32  }
  0x80   :  { %3620 = vsyncadd [#allocation11], 4294967264 }
  0x81   :  { %3621 = dma.done.wait [#allocation14], 32  }
  0x82   :  { %3622 = vsyncadd [#allocation14], 4294967264  ;;  %v3634_v0 = vmov 0.0   ;;  %v3635_v1 = vmov 0.0|0.0   ;;  %vm4377_vm0 = vmmov 0   ;;  %v144_v2 = vld [vmem:[%s4361_s2 + $0x8] sm:$0xff]  ;;  %v149_v22 = vlaneseq }
  0x83   :  { %230 = vmatprep.mubr.f32.mxu0 %v3634_v0  ;;  %3149 = vmatprep.subr.bf16.mxu1 %v3635_v1  ;;  %v146_v3 = vld [vmem:[%s4361_s2 + $0x18] sm:$0xff]  ;;  %v143_v4 = vld [vmem:[%s4361_s2] sm:$0xff]  ;;  %v145_v6 = vld [vmem:[%s4361_s2 + $0x10] sm:$0xff]  ;;  %s4380_s11 = sld [smem:[#allocation22_spill]]  ;;  %vm159_vm1 = vcmask 130048   ;;  %s3638_s3 = smov 32  }
  0x84   :  { %2919 = vmatprep.mubr.msk.f32.mxu1 %vm4377_vm0, %v3634_v0  ;;  %v3145_v5 = vpack.c.bf16 %v146_v3, %v144_v2  ;;  %v247_v7 = vld [vmem:[#allocation4] sm:$0xff]  ;;  %v3147_v8 = vpack.c.bf16 %v145_v6, %v143_v4  ;;  %v248_v9 = vld [vmem:[#allocation4 + $0x8] sm:$0xff]  ;;  %v249_v13 = vld [vmem:[#allocation4 + $0x10] sm:$0xff]  ;;  %v3892_v23 = vshrl.u32 %v149_v22, 7  ;;  %vm458_vm2 = vcmask 253952  }
  0x85   :  { %v251_v10 = vld [vmem:[#allocation7] sm:$0xff]  ;;  %v3850_v11 = vpack.c.bf16 %v248_v9, %v247_v7  ;;  %v252_v12 = vld [vmem:[#allocation7 + $0x8] sm:$0xff]  ;;  %v250_v14 = vld [vmem:[#allocation4 + $0x18] sm:$0xff]  ;;  %vm466_vm3 = vcmask 254977   ;;  %vm257_vm4 = vcmask 261120   ;;  %vm464_vm5 = vcmask 522502  }
  0x86   :  { %3146 = vmatprep.subr.bf16.mxu0 %v3145_v5  ;;  %v3855_v16 = vpack.c.bf16 %v252_v12, %v251_v10  ;;  %v3859_v17 = vpack.c.bf16 %v250_v14, %v249_v13  ;;  %v253_v18 = vld [vmem:[#allocation7 + $0x10] sm:$0xff]  ;;  %v254_v19 = vld [vmem:[#allocation7 + $0x18] sm:$0xff]  ;;  %v3895_v24 = vsub.s32 0, %v3892_v23  ;;  %v155_v26 = vsub.s32 1, %v3892_v23 }
  0x87   :  { %3148 = vmatpush1.bf16.msra.mxu0 %v3147_v8  ;;  %3151 = vmatpush3.bf16.msra.mxu1 %v3850_v11  ;;  %v3868_v21 = vpack.c.bf16 %v254_v19, %v253_v18  ;;  %v147_v25 = vld [vmem:[%s4364_s5] sm:$0x3]  ;;  %s3637_s5 = smov 64   ;;  %vm468_vm6 = vcmask 523527   ;;  %vm691_vm7 = vcmask 520452   ;;  %vm695_vm8 = vcmask 521477  }
  0x88   :  { %3155 = vmatprep.subr.bf16.mxu0 %v3635_v1  ;;  %3152 = vmatprep.subr.bf16.mxu1 %v3635_v1  ;;  %v152_v27 = vrot.slane %v147_v25, %v3895_v24  ;;  %v156_v28 = vrot.slane %v147_v25, %v155_v26  ;;  %vm685_vm9 = vcmask 256002   ;;  %vm693_vm10 = vcmask 257027  }
  0x89   :  { %v141_v15 = vld [vmem:[%s4380_s11] sm:$0xff]  ;;  %v142_v20 = vld [vmem:[%s4380_s11 + $0x8] sm:$0xff]  ;;  %vm921_vm11 = vcmask 518402   ;;  %vm925_vm12 = vcmask 519427   ;;  %vm915_vm13 = vcmask 258052   ;;  %vm923_vm14 = vcmask 259077  }
  0x8a   :  { %2758 = vmatmul.mubr.msk.f32.vlgmr.msra.gmra.mrb[0].mxu0 %vm159_vm1, %v141_v15  ;;  %vm1148_vm15 = vcmask 516352  }
  0x8b   :  { %236 = vmatprep.mubr.f32.mxu0 %v3634_v0  ;;  %3157 = vmatpush3.bf16.msra.mxu0 %v3855_v16 }
  0x8c   :  { %3154 = vmatpush3.bf16.msra.mxu1 %v3859_v17  ;;  %3158 = vmatprep.subr.bf16.mxu0 %v3635_v1 }
  0x8d   :  { %3161 = vmatprep.subr.bf16.mxu1 %v3635_v1 }
  0x8e   :  { %2759 = vmatmul.mubr.msk.f32.gmra.mrb[2].mxu0 %vm159_vm1, %v142_v20  ;;  %vm1152_vm1 = vcmask 517377  }
  0x8f   :  { %3160 = vmatpush3.bf16.msra.mxu0 %v3868_v21  ;;  %2920 = vmatmul.mubr.f32.vlgmr.msra.gmra.mrb[0].mxu1 %v3634_v0 }
  0x90   :  { %2930 = vmatprep.mubr.msk.f32.mxu0 %vm4377_vm0, %v3634_v0  ;;  %3163 = vmatpush3.bf16.msra.mxu1 %v3850_v11 }
  0x91   :  { %3164 = vmatprep.subr.bf16.mxu1 %v3635_v1  ;;  %2941 = vmatprep.mubr.msk.f32.mxu1 %vm4377_vm0, %v3634_v0 }
  0x92   :  { %2931 = vmatmul.mubr.f32.vlgmr.msra.gmra.mrb[4].mxu0 %v3634_v0  ;;  %3167 = vmatprep.subr.bf16.mxu0 %v3635_v1 }
  0x93   :  { %3169 = vmatpush3.bf16.msra.mxu0 %v3855_v16  ;;  %2952 = vmatprep.mubr.msk.f32.mxu0 %vm4377_vm0, %v3634_v0 }
  0x94   :  { %3166 = vmatpush3.bf16.msra.mxu1 %v3859_v17  ;;  %3170 = vmatprep.subr.bf16.mxu0 %v3635_v1 }
  0x95   :  { %3173 = vmatprep.subr.bf16.mxu1 %v3635_v1 }
  0x97   :  { %3172 = vmatpush3.bf16.msra.mxu0 %v3868_v21 }
  0x98   :  { %3179 = vmatprep.subr.bf16.mxu0 %v3635_v1 }
 0x15d   :  { %v232_v29 = vpop.f32.mrb[0].mxu0 }
 0x15e   :  { %v233_v30 = vadd.f32 %v232_v29, %v152_v27  ;;  %v234_v31 = vpop.f32.mrb[1].mxu0 }
 0x15f   :  { %v235_v32 = vadd.f32 %v234_v31, %v156_v28 }
 0x160   :  { %243 = vst [vmem:[#allocation2] sm:$0xff] %v233_v30 }
 0x161   :  { %244 = vst [vmem:[#allocation2 + $0x8] sm:$0xff] %v235_v32  ;;  %v238_v33 = vpop.f32.mrb[2].mxu0 }
 0x162   :  { %v239_v34 = vadd.f32 %v238_v33, %v152_v27  ;;  %v240_v35 = vpop.f32.mrb[3].mxu0  ;;  %v327_v36 = vpop.f32.mrb[0].mxu1 }
 0x163   :  { %v241_v37 = vadd.f32 %v240_v35, %v156_v28  ;;  %v2921_v38 = vpop.f32.mrb[1].mxu1 }
 0x164   :  { %245 = vst [vmem:[#allocation2 + $0x10] sm:$0xff] %v239_v34 }
 0x165   :  { %246 = vst [vmem:[#allocation2 + $0x18] sm:$0xff] %v241_v37  ;;  %v422_v39 = vpop.f32.mrb[4].mxu0 }
 0x166   :  { %v2932_v40 = vpop.f32.mrb[5].mxu0  ;;  %v427_v43 = vrot.slane %v422_v39, 2 }
 0x167   :  { %v255_v41 = vld [vmem:[#allocation2] sm:$0x3]  ;;  %v470_v19 = vld [vmem:[#allocation2] sm:$0xc] }
 0x168   :  { %v331_v42 = vadd.f32 %v327_v36, %v255_v41 }
 0x16a   :  { %3301 = vtanh.f32 %v331_v42  ;;  %v2760_v48 = vmul.f32 -1.442695, %v331_v42 }
 0x16c   :  { %v256_v44 = vld [vmem:[#allocation2 + $0x18] sm:$0xc0]  ;;  %v471_v28 = vld [vmem:[#allocation2 + $0x18] sm:$0x30] }
 0x16d   :  { %v429_v45 = vadd.f32 %v427_v43, %v256_v44 }
 0x16f   :  { %3303 = vtanh.f32 %v429_v45  ;;  %v2761_v49 = vmul.f32 -1.442695, %v429_v45 }
 0x170   :  { %3305 = vpow2.f32 %v2760_v48 }
 0x171   :  { %3307 = vpow2.f32 %v2761_v49 }
 0x174   :  { %v3302_v46 = vpop.eup %3301 }
 0x175   :  { %341 = vrot.lane.b32.xlu0 %v3302_v46, %s3637_s5 }
 0x179   :  { %v3304_v47 = vpop.eup %3303 }
 0x17a   :  { %439 = vrot.lane.b32.xlu0 %v3304_v47, %s3637_s5  ;;  %v3306_v50 = vpop.eup %3305 }
 0x17b   :  { %v335_v51 = vadd.f32 1.0, %v3306_v50  ;;  %v3308_v52 = vpop.eup %3307 }
 0x17c   :  { %v433_v53 = vadd.f32 1.0, %v3308_v52 }
 0x17d   :  { %3309 = vrcp.f32 %v335_v51 }
 0x17e   :  { %3311 = vrcp.f32 %v433_v53 }
 0x187   :  { %v3310_v54 = vpop.eup %3309 }
 0x188   :  { %v3312_v57 = vpop.eup %3311  ;;  %v339_v60 = vmul.f32 0.0, %v3310_v54 }
 0x189   :  { %v437_v63 = vmul.f32 0.0, %v3312_v57 }
 0x1e7   :  { %v342_v55 = vpop.permute.xlu0 %341 }
 0x1e8   :  { %v344_v56 = vmul.f32 %v3310_v54, %v342_v55 }
 0x1ea   :  { %346 = vrot.lane.b32.xlu1 %v344_v56, %s3638_s3 }
 0x1ec   :  { %v440_v58 = vpop.permute.xlu0 %439 }
 0x1ed   :  { %v442_v59 = vmul.f32 %v3312_v57, %v440_v58 }
 0x1ef   :  { %444 = vrot.lane.b32.xlu1 %v442_v59, %s3638_s3 }
 0x25c   :  { %v347_v61 = vpop.permute.xlu1 %346 }
 0x25d   :  { %v3908_v62 = vadd.f32 %v347_v61, %v339_v60 }
 0x25f   :  { %3313 = vtanh.f32 %v3908_v62  ;;  %v556_v44 = vrot.slane %v3908_v62, 6 }
 0x261   :  { %v445_v2 = vpop.permute.xlu1 %444 }
 0x262   :  { %v3911_v3 = vadd.f32 %v445_v2, %v437_v63 }
 0x264   :  { %3315 = vtanh.f32 %v3911_v3  ;;  %v662_v48 = vrot.slane %v3911_v3, 2  ;;  %v697_v3 = vld [vmem:[#allocation2] sm:$0x30] }
 0x269   :  { %v3314_v4 = vpop.eup %3313 }
 0x26a   :  { %352 = vrot.lane.b32.xlu0 %v3314_v4, %s3637_s5 }
 0x26e   :  { %v3316_v5 = vpop.eup %3315 }
 0x26f   :  { %450 = vrot.lane.b32.xlu1 %v3316_v5, %s3637_s5 }
 0x2dc   :  { %v353_v6 = vpop.permute.xlu0 %352 }
 0x2dd   :  { %v355_v7 = vmul.f32 %v3310_v54, %v353_v6 }
 0x2df   :  { %455 = vrot.lane.b32.xlu0 %v355_v7, %s3638_s3 }
 0x2e1   :  { %v451_v8 = vpop.permute.xlu1 %450 }
 0x2e2   :  { %v3917_v9 = vmul.f32 %v3312_v57, %v451_v8  ;;  %v698_v8 = vld [vmem:[#allocation2 + $0x18] sm:$0xc] }
 0x2e4   :  { %v575_v10 = vrot.slane %v3917_v9, 6 }
 0x2e6   :  { %576 = vrot.lane.b32.xlu1 %v575_v10, %s3638_s3 }
 0x351   :  { %v456_v12 = vpop.permute.xlu0 %455 }
 0x352   :  { %459 = vst.msk [vmem:[#allocation3] sm:$0x1] %vm458_vm2, %v456_v12  ;;  %2942 = vmatmul.mubr.msk.f32.vlgmr.msra.gmra.mrb[2].mxu1 %vm257_vm4, %v456_v12 }
 0x353   :  { %467 = vst.msk [vmem:[#allocation3 + $0x7] sm:$0x2] %vm466_vm3, %v456_v12  ;;  %3175 = vmatpush3.bf16.msra.mxu1 %v3850_v11  ;;  %2963 = vmatprep.mubr.msk.f32.mxu1 %vm4377_vm0, %v3634_v0 }
 0x354   :  { %3176 = vmatprep.subr.bf16.mxu1 %v3635_v1 }
 0x357   :  { %3178 = vmatpush3.bf16.msra.mxu1 %v3859_v17 }
 0x358   :  { %v577_v13 = vpop.permute.xlu1 %576  ;;  %3185 = vmatprep.subr.bf16.mxu1 %v3635_v1 }
 0x359   :  { %2953 = vmatmul.mubr.msk.f32.vlgmr.msra.gmra.mrb[6].mxu0 %vm257_vm4, %v577_v13 }
 0x35a   :  { %3181 = vmatpush3.bf16.msra.mxu0 %v3855_v16  ;;  %2974 = vmatprep.mubr.msk.f32.mxu0 %vm4377_vm0, %v3634_v0 }
 0x35b   :  { %3182 = vmatprep.subr.bf16.mxu0 %v3635_v1 }
 0x35e   :  { %3184 = vmatpush3.bf16.msra.mxu0 %v3868_v21 }
 0x35f   :  { %3191 = vmatprep.subr.bf16.mxu0 %v3635_v1 }
 0x425   :  { %v540_v14 = vpop.f32.mrb[2].mxu1 }
 0x426   :  { %v545_v15 = vrot.slane %v540_v14, 6  ;;  %v2943_v18 = vpop.f32.mrb[3].mxu1 }
 0x428   :  { %v547_v20 = vadd.f32 %v545_v15, %v470_v19 }
 0x42a   :  { %3317 = vtanh.f32 %v547_v20  ;;  %v2763_v32 = vmul.f32 -1.442695, %v547_v20 }
 0x42c   :  { %v646_v22 = vpop.f32.mrb[6].mxu0 }
 0x42d   :  { %v651_v25 = vrot.slane %v646_v22, 4  ;;  %v2954_v27 = vpop.f32.mrb[7].mxu0 }
 0x42f   :  { %v653_v29 = vadd.f32 %v651_v25, %v471_v28 }
 0x431   :  { %3319 = vtanh.f32 %v653_v29  ;;  %v2765_v33 = vmul.f32 -1.442695, %v653_v29 }
 0x432   :  { %3321 = vpow2.f32 %v2763_v32 }
 0x433   :  { %3323 = vpow2.f32 %v2765_v33 }
 0x434   :  { %v3318_v30 = vpop.eup %3317 }
 0x435   :  { %560 = vrot.lane.b32.xlu0 %v3318_v30, %s3637_s5 }
 0x43b   :  { %v3320_v31 = vpop.eup %3319 }
 0x43c   :  { %666 = vrot.lane.b32.xlu1 %v3320_v31, %s3637_s5  ;;  %v3322_v34 = vpop.eup %3321 }
 0x43d   :  { %v551_v35 = vadd.f32 1.0, %v3322_v34  ;;  %v3324_v36 = vpop.eup %3323 }
 0x43e   :  { %v657_v37 = vadd.f32 1.0, %v3324_v36 }
 0x43f   :  { %3325 = vrcp.f32 %v551_v35 }
 0x440   :  { %3327 = vrcp.f32 %v657_v37 }
 0x449   :  { %v3326_v38 = vpop.eup %3325 }
 0x44a   :  { %v3328_v41 = vpop.eup %3327  ;;  %v558_v45 = vmul.f32 %v3326_v38, %v556_v44 }
 0x44b   :  { %v664_v49 = vmul.f32 %v3328_v41, %v662_v48 }
 0x4a7   :  { %v561_v39 = vpop.permute.xlu0 %560 }
 0x4a8   :  { %v563_v40 = vmul.f32 %v3326_v38, %v561_v39 }
 0x4aa   :  { %565 = vrot.lane.b32.xlu0 %v563_v40, %s3638_s3 }
 0x4ae   :  { %v667_v42 = vpop.permute.xlu1 %666 }
 0x4af   :  { %v669_v43 = vmul.f32 %v3328_v41, %v667_v42 }
 0x4b1   :  { %671 = vrot.lane.b32.xlu1 %v669_v43, %s3638_s3 }
 0x51c   :  { %v566_v46 = vpop.permute.xlu0 %565 }
 0x51d   :  { %v3942_v47 = vadd.f32 %v566_v46, %v558_v45 }
 0x51f   :  { %3329 = vtanh.f32 %v3942_v47  ;;  %v786_v32 = vrot.slane %v3942_v47, 6 }
 0x523   :  { %v672_v50 = vpop.permute.xlu1 %671 }
 0x524   :  { %v3946_v51 = vadd.f32 %v672_v50, %v664_v49 }
 0x526   :  { %3331 = vtanh.f32 %v3946_v51  ;;  %v892_v36 = vrot.slane %v3946_v51, 2 }
 0x529   :  { %v3330_v52 = vpop.eup %3329 }
 0x52a   :  { %571 = vrot.lane.b32.xlu0 %v3330_v52, %s3637_s5 }
 0x530   :  { %v3332_v53 = vpop.eup %3331 }
 0x531   :  { %677 = vrot.lane.b32.xlu1 %v3332_v53, %s3637_s5  ;;  %v927_v53 = vld [vmem:[#allocation2] sm:$0xc0] }
 0x59c   :  { %v572_v54 = vpop.permute.xlu0 %571 }
 0x59d   :  { %v3951_v55 = vmul.f32 %v3326_v38, %v572_v54 }
 0x59f   :  { %v699_v56 = vrot.slane %v3951_v55, 2 }
 0x5a1   :  { %700 = vrot.lane.b32.xlu0 %v699_v56, %s3638_s3  ;;  %v928_v56 = vld [vmem:[#allocation2 + $0x18] sm:$0x3] }
 0x5a3   :  { %v678_v57 = vpop.permute.xlu1 %677 }
 0x5a4   :  { %v3955_v58 = vmul.f32 %v3328_v41, %v678_v57 }
 0x5a6   :  { %v805_v59 = vrot.slane %v3955_v58, 4 }
 0x5a8   :  { %806 = vrot.lane.b32.xlu1 %v805_v59, %s3638_s3 }
 0x613   :  { %v701_v60 = vpop.permute.xlu0 %700 }
 0x614   :  { %2964 = vmatmul.mubr.msk.f32.vlgmr.msra.gmra.mrb[4].mxu1 %vm257_vm4, %v701_v60 }
 0x615   :  { %3187 = vmatpush3.bf16.msra.mxu1 %v3850_v11  ;;  %2985 = vmatprep.mubr.msk.f32.mxu1 %vm4377_vm0, %v3634_v0 }
 0x616   :  { %3188 = vmatprep.subr.bf16.mxu1 %v3635_v1 }
 0x619   :  { %3190 = vmatpush3.bf16.msra.mxu1 %v3859_v17 }
 0x61a   :  { %v807_v61 = vpop.permute.xlu1 %806  ;;  %3197 = vmatprep.subr.bf16.mxu1 %v3635_v1 }
 0x61b   :  { %2975 = vmatmul.mubr.msk.f32.vlgmr.msra.gmra.mrb[8].mxu0 %vm257_vm4, %v807_v61 }
 0x61c   :  { %3193 = vmatpush3.bf16.msra.mxu0 %v3855_v16  ;;  %2996 = vmatprep.mubr.msk.f32.mxu0 %vm4377_vm0, %v3634_v0 }
 0x61d   :  { %3194 = vmatprep.subr.bf16.mxu0 %v3635_v1 }
 0x620   :  { %3196 = vmatpush3.bf16.msra.mxu0 %v3868_v21 }
 0x621   :  { %3203 = vmatprep.subr.bf16.mxu0 %v3635_v1 }
 0x6e7   :  { %v770_v62 = vpop.f32.mrb[4].mxu1 }
 0x6e8   :  { %v775_v63 = vrot.slane %v770_v62, 4  ;;  %v2965_v2 = vpop.f32.mrb[5].mxu1 }
 0x6ea   :  { %v777_v4 = vadd.f32 %v775_v63, %v697_v3 }
 0x6ec   :  { %3333 = vtanh.f32 %v777_v4  ;;  %v2767_v14 = vmul.f32 -1.442695, %v777_v4 }
 0x6ee   :  { %v876_v5 = vpop.f32.mrb[8].mxu0 }
 0x6ef   :  { %v881_v6 = vrot.slane %v876_v5, 6  ;;  %v2976_v7 = vpop.f32.mrb[9].mxu0 }
 0x6f1   :  { %v883_v10 = vadd.f32 %v881_v6, %v698_v8 }
 0x6f3   :  { %3335 = vtanh.f32 %v883_v10  ;;  %v2769_v15 = vmul.f32 -1.442695, %v883_v10 }
 0x6f4   :  { %3337 = vpow2.f32 %v2767_v14 }
 0x6f5   :  { %3339 = vpow2.f32 %v2769_v15 }
 0x6f6   :  { %v3334_v12 = vpop.eup %3333 }
 0x6f7   :  { %790 = vrot.lane.b32.xlu0 %v3334_v12, %s3637_s5 }
 0x6fd   :  { %v3336_v13 = vpop.eup %3335 }
 0x6fe   :  { %896 = vrot.lane.b32.xlu1 %v3336_v13, %s3637_s5  ;;  %v3338_v18 = vpop.eup %3337 }
 0x6ff   :  { %v781_v19 = vadd.f32 1.0, %v3338_v18  ;;  %v3340_v20 = vpop.eup %3339 }
 0x700   :  { %v887_v22 = vadd.f32 1.0, %v3340_v20 }
 0x701   :  { %3341 = vrcp.f32 %v781_v19 }
 0x702   :  { %3343 = vrcp.f32 %v887_v22 }
 0x70b   :  { %v3342_v25 = vpop.eup %3341 }
 0x70c   :  { %v3344_v29 = vpop.eup %3343  ;;  %v788_v33 = vmul.f32 %v3342_v25, %v786_v32 }
 0x70d   :  { %v894_v37 = vmul.f32 %v3344_v29, %v892_v36 }
 0x769   :  { %v791_v27 = vpop.permute.xlu0 %790 }
 0x76a   :  { %v793_v28 = vmul.f32 %v3342_v25, %v791_v27 }
 0x76c   :  { %795 = vrot.lane.b32.xlu0 %v793_v28, %s3638_s3 }
 0x770   :  { %v897_v30 = vpop.permute.xlu1 %896 }
 0x771   :  { %v899_v31 = vmul.f32 %v3344_v29, %v897_v30 }
 0x773   :  { %901 = vrot.lane.b32.xlu1 %v899_v31, %s3638_s3 }
 0x7de   :  { %v796_v34 = vpop.permute.xlu0 %795 }
 0x7df   :  { %v3978_v35 = vadd.f32 %v796_v34, %v788_v33 }
 0x7e1   :  { %3345 = vtanh.f32 %v3978_v35  ;;  %v1016_v15 = vrot.slane %v3978_v35, 6 }
 0x7e5   :  { %v902_v38 = vpop.permute.xlu1 %901 }
 0x7e6   :  { %v3982_v39 = vadd.f32 %v902_v38, %v894_v37  ;;  %v1154_v38 = vld [vmem:[#allocation2 + $0x10] sm:$0x3] }
 0x7e8   :  { %3347 = vtanh.f32 %v3982_v39  ;;  %v1119_v22 = vrot.slane %v3982_v39, 2 }
 0x7eb   :  { %v3346_v40 = vpop.eup %3345 }
 0x7ec   :  { %801 = vrot.lane.b32.xlu0 %v3346_v40, %s3637_s5 }
 0x7f2   :  { %v3348_v41 = vpop.eup %3347 }
 0x7f3   :  { %907 = vrot.lane.b32.xlu1 %v3348_v41, %s3637_s5 }
 0x85e   :  { %v802_v42 = vpop.permute.xlu0 %801 }
 0x85f   :  { %v3987_v43 = vmul.f32 %v3342_v25, %v802_v42 }
 0x861   :  { %v929_v44 = vrot.slane %v3987_v43, 4 }
 0x863   :  { %930 = vrot.lane.b32.xlu0 %v929_v44, %s3638_s3 }
 0x865   :  { %v908_v45 = vpop.permute.xlu1 %907 }
 0x866   :  { %v3991_v46 = vmul.f32 %v3344_v29, %v908_v45 }
 0x868   :  { %v1035_v47 = vrot.slane %v3991_v46, 2 }
 0x86a   :  { %1036 = vrot.lane.b32.xlu1 %v1035_v47, %s3638_s3  ;;  %v1155_v47 = vld [vmem:[#allocation2 + $0x8] sm:$0xc0] }
 0x8d5   :  { %v931_v48 = vpop.permute.xlu0 %930 }
 0x8d6   :  { %2986 = vmatmul.mubr.msk.f32.vlgmr.msra.gmra.mrb[6].mxu1 %vm257_vm4, %v931_v48 }
 0x8d7   :  { %3199 = vmatpush3.bf16.msra.mxu1 %v3850_v11  ;;  %3007 = vmatprep.mubr.msk.f32.mxu1 %vm4377_vm0, %v3634_v0 }
 0x8d8   :  { %3200 = vmatprep.subr.bf16.mxu1 %v3635_v1 }
 0x8db   :  { %3202 = vmatpush3.bf16.msra.mxu1 %v3859_v17 }
 0x8dc   :  { %v1037_v49 = vpop.permute.xlu1 %1036  ;;  %3209 = vmatprep.subr.bf16.mxu1 %v3635_v1 }
 0x8dd   :  { %2997 = vmatmul.mubr.msk.f32.vlgmr.msra.gmra.mrb[10].mxu0 %vm257_vm4, %v1037_v49 }
 0x8de   :  { %3205 = vmatpush3.bf16.msra.mxu0 %v3855_v16  ;;  %3018 = vmatprep.mubr.msk.f32.mxu0 %vm4377_vm0, %v3634_v0 }
 0x8df   :  { %3206 = vmatprep.subr.bf16.mxu0 %v3635_v1 }
 0x8e2   :  { %3208 = vmatpush3.bf16.msra.mxu0 %v3868_v21 }
 0x8e3   :  { %3215 = vmatprep.subr.bf16.mxu0 %v3635_v1 }
 0x9a9   :  { %v1000_v50 = vpop.f32.mrb[6].mxu1 }
 0x9aa   :  { %v1005_v51 = vrot.slane %v1000_v50, 2  ;;  %v2987_v52 = vpop.f32.mrb[7].mxu1 }
 0x9ac   :  { %v1007_v54 = vadd.f32 %v1005_v51, %v927_v53 }
 0x9ae   :  { %3349 = vtanh.f32 %v1007_v54  ;;  %v2771_v63 = vmul.f32 -1.442695, %v1007_v54 }
 0x9b0   :  { %v1106_v57 = vpop.f32.mrb[10].mxu0 }
 0x9b1   :  { %v1110_v59 = vadd.f32 %v1106_v57, %v928_v56  ;;  %v2998_v60 = vpop.f32.mrb[11].mxu0 }
 0x9b3   :  { %3351 = vtanh.f32 %v1110_v59  ;;  %v2773_v2 = vmul.f32 -1.442695, %v1110_v59 }
 0x9b4   :  { %3353 = vpow2.f32 %v2771_v63 }
 0x9b5   :  { %3355 = vpow2.f32 %v2773_v2 }
 0x9b8   :  { %v3350_v61 = vpop.eup %3349 }
 0x9b9   :  { %1020 = vrot.lane.b32.xlu0 %v3350_v61, %s3637_s5 }
 0x9bd   :  { %v3352_v62 = vpop.eup %3351 }
 0x9be   :  { %1123 = vrot.lane.b32.xlu1 %v3352_v62, %s3637_s5  ;;  %v3354_v3 = vpop.eup %3353 }
 0x9bf   :  { %v1011_v4 = vadd.f32 1.0, %v3354_v3  ;;  %v3356_v5 = vpop.eup %3355 }
 0x9c0   :  { %v1114_v6 = vadd.f32 1.0, %v3356_v5 }
 0x9c1   :  { %3357 = vrcp.f32 %v1011_v4 }
 0x9c2   :  { %3359 = vrcp.f32 %v1114_v6 }
 0x9cb   :  { %v3358_v7 = vpop.eup %3357 }
 0x9cc   :  { %v3360_v12 = vpop.eup %3359  ;;  %v1018_v18 = vmul.f32 %v3358_v7, %v1016_v15 }
 0x9cd   :  { %v1121_v25 = vmul.f32 %v3360_v12, %v1119_v22 }
 0xa2b   :  { %v1021_v8 = vpop.permute.xlu0 %1020 }
 0xa2c   :  { %v1023_v10 = vmul.f32 %v3358_v7, %v1021_v8 }
 0xa2e   :  { %1025 = vrot.lane.b32.xlu0 %v1023_v10, %s3638_s3 }
 0xa30   :  { %v1124_v13 = vpop.permute.xlu1 %1123 }
 0xa31   :  { %v1126_v14 = vmul.f32 %v3360_v12, %v1124_v13 }
 0xa33   :  { %1128 = vrot.lane.b32.xlu1 %v1126_v14, %s3638_s3 }
 0xaa0   :  { %v1026_v19 = vpop.permute.xlu0 %1025 }
 0xaa1   :  { %v4014_v20 = vadd.f32 %v1026_v19, %v1018_v18 }
 0xaa3   :  { %3361 = vtanh.f32 %v4014_v20  ;;  %v1240_v3 = vrot.slane %v4014_v20, 6 }
 0xaa5   :  { %v1129_v27 = vpop.permute.xlu1 %1128 }
 0xaa6   :  { %v4018_v28 = vadd.f32 %v1129_v27, %v1121_v25 }
 0xaa8   :  { %3363 = vtanh.f32 %v4018_v28 }
 0xaad   :  { %v3362_v29 = vpop.eup %3361 }
 0xaae   :  { %1031 = vrot.lane.b32.xlu0 %v3362_v29, %s3637_s5 }
 0xab2   :  { %v3364_v30 = vpop.eup %3363 }
 0xab3   :  { %1134 = vrot.lane.b32.xlu1 %v3364_v30, %s3637_s5 }
 0xb20   :  { %v1032_v31 = vpop.permute.xlu0 %1031 }
 0xb21   :  { %v4023_v32 = vmul.f32 %v3358_v7, %v1032_v31  ;;  %v1345_v7 = vrot.slane %v4018_v28, 2  ;;  %v1376_v31 = vld [vmem:[#allocation2 + $0x10] sm:$0xc] }
 0xb23   :  { %v1156_v33 = vrot.slane %v4023_v32, 6 }
 0xb25   :  { %v1135_v34 = vpop.permute.xlu1 %1134  ;;  %1157 = vrot.lane.b32.xlu1 %v1156_v33, %s3638_s3 }
 0xb26   :  { %v4027_v35 = vmul.f32 %v3360_v12, %v1135_v34 }
 0xb28   :  { %1259 = vrot.lane.b32.xlu0 %v4027_v35, %s3638_s3 }
 0xb97   :  { %v1158_v36 = vpop.permute.xlu1 %1157 }
 0xb98   :  { %3008 = vmatmul.mubr.msk.f32.vlgmr.msra.gmra.mrb[8].mxu1 %vm257_vm4, %v1158_v36 }
 0xb99   :  { %3211 = vmatpush3.bf16.msra.mxu1 %v3850_v11  ;;  %3029 = vmatprep.mubr.msk.f32.mxu1 %vm4377_vm0, %v3634_v0 }
 0xb9a   :  { %v1260_v37 = vpop.permute.xlu0 %1259  ;;  %3212 = vmatprep.subr.bf16.mxu1 %v3635_v1 }
 0xb9b   :  { %3019 = vmatmul.mubr.msk.f32.vlgmr.msra.gmra.mrb[12].mxu0 %vm257_vm4, %v1260_v37 }
 0xb9c   :  { %3217 = vmatpush3.bf16.msra.mxu0 %v3855_v16  ;;  %3040 = vmatprep.mubr.msk.f32.mxu0 %vm4377_vm0, %v3634_v0 }
 0xb9d   :  { %3214 = vmatpush3.bf16.msra.mxu1 %v3859_v17  ;;  %3218 = vmatprep.subr.bf16.mxu0 %v3635_v1 }
 0xb9e   :  { %3221 = vmatprep.subr.bf16.mxu1 %v3635_v1 }
 0xba0   :  { %3220 = vmatpush3.bf16.msra.mxu0 %v3868_v21 }
 0xba1   :  { %3227 = vmatprep.subr.bf16.mxu0 %v3635_v1 }
 0xc6b   :  { %v1227_v39 = vpop.f32.mrb[8].mxu1 }
 0xc6c   :  { %v1231_v40 = vadd.f32 %v1227_v39, %v1154_v38  ;;  %v3009_v41 = vpop.f32.mrb[9].mxu1  ;;  %v1377_v38 = vld [vmem:[#allocation2 + $0x8] sm:$0x30] }
 0xc6e   :  { %3365 = vtanh.f32 %v1231_v40  ;;  %v1329_v42 = vpop.f32.mrb[12].mxu0  ;;  %v2775_v51 = vmul.f32 -1.442695, %v1231_v40 }
 0xc6f   :  { %v1334_v44 = vrot.slane %v1329_v42, 2  ;;  %v3020_v45 = vpop.f32.mrb[13].mxu0 }
 0xc71   :  { %v1336_v48 = vadd.f32 %v1334_v44, %v1155_v47 }
 0xc73   :  { %3367 = vtanh.f32 %v1336_v48  ;;  %v2777_v52 = vmul.f32 -1.442695, %v1336_v48 }
 0xc74   :  { %3369 = vpow2.f32 %v2775_v51 }
 0xc75   :  { %3371 = vpow2.f32 %v2777_v52 }
 0xc78   :  { %v3366_v49 = vpop.eup %3365 }
 0xc79   :  { %1244 = vrot.lane.b32.xlu0 %v3366_v49, %s3637_s5 }
 0xc7d   :  { %v3368_v50 = vpop.eup %3367 }
 0xc7e   :  { %1349 = vrot.lane.b32.xlu1 %v3368_v50, %s3637_s5  ;;  %v3370_v53 = vpop.eup %3369 }
 0xc7f   :  { %v1235_v54 = vadd.f32 1.0, %v3370_v53  ;;  %v3372_v56 = vpop.eup %3371 }
 0xc80   :  { %v1340_v57 = vadd.f32 1.0, %v3372_v56 }
 0xc81   :  { %3373 = vrcp.f32 %v1235_v54 }
 0xc82   :  { %3375 = vrcp.f32 %v1340_v57 }
 0xc8b   :  { %v3374_v59 = vpop.eup %3373 }
 0xc8c   :  { %v3376_v62 = vpop.eup %3375  ;;  %v1242_v4 = vmul.f32 %v3374_v59, %v1240_v3 }
 0xc8d   :  { %v1347_v8 = vmul.f32 %v3376_v62, %v1345_v7 }
 0xceb   :  { %v1245_v60 = vpop.permute.xlu0 %1244 }
 0xcec   :  { %v1247_v61 = vmul.f32 %v3374_v59, %v1245_v60 }
 0xcee   :  { %1249 = vrot.lane.b32.xlu0 %v1247_v61, %s3638_s3 }
 0xcf0   :  { %v1350_v63 = vpop.permute.xlu1 %1349 }
 0xcf1   :  { %v1352_v2 = vmul.f32 %v3376_v62, %v1350_v63 }
 0xcf3   :  { %1354 = vrot.lane.b32.xlu1 %v1352_v2, %s3638_s3 }
 0xd60   :  { %v1250_v5 = vpop.permute.xlu0 %1249 }
 0xd61   :  { %v4050_v6 = vadd.f32 %v1250_v5, %v1242_v4 }
 0xd63   :  { %3377 = vtanh.f32 %v4050_v6  ;;  %v1462_v57 = vrot.slane %v4050_v6, 6 }
 0xd65   :  { %v1355_v10 = vpop.permute.xlu1 %1354 }
 0xd66   :  { %v4054_v12 = vadd.f32 %v1355_v10, %v1347_v8 }
 0xd68   :  { %3379 = vtanh.f32 %v4054_v12 }
 0xd6d   :  { %v3378_v13 = vpop.eup %3377 }
 0xd6e   :  { %1255 = vrot.lane.b32.xlu0 %v3378_v13, %s3637_s5 }
 0xd72   :  { %v3380_v14 = vpop.eup %3379 }
 0xd73   :  { %1360 = vrot.lane.b32.xlu1 %v3380_v14, %s3637_s5 }
 0xde0   :  { %v1256_v15 = vpop.permute.xlu0 %1255 }
 0xde1   :  { %v1258_v18 = vmul.f32 %v3374_v59, %v1256_v15 }
 0xde3   :  { %1365 = vrot.lane.b32.xlu0 %v1258_v18, %s3638_s3 }
 0xde5   :  { %v1361_v19 = vpop.permute.xlu1 %1360 }
 0xde6   :  { %v4060_v20 = vmul.f32 %v3376_v62, %v1361_v19  ;;  %v1568_v62 = vrot.slane %v4054_v12, 2 }
 0xde8   :  { %v1481_v22 = vrot.slane %v4060_v20, 6 }
 0xdea   :  { %1482 = vrot.lane.b32.xlu1 %v1481_v22, %s3638_s3  ;;  %v1599_v22 = vld [vmem:[#allocation2 + $0x10] sm:$0x30] }
 0xe55   :  { %v4064_v25 = vpop.permute.xlu0 %1365 }
 0xe56   :  { %3030 = vmatmul.mubr.msk.f32.vlgmr.msra.gmra.mrb[10].mxu1 %vm257_vm4, %v4064_v25 }
 0xe57   :  { %3223 = vmatpush3.bf16.msra.mxu1 %v3850_v11  ;;  %3051 = vmatprep.mubr.msk.f32.mxu1 %vm4377_vm0, %v3634_v0 }
 0xe58   :  { %3224 = vmatprep.subr.bf16.mxu1 %v3635_v1 }
 0xe5b   :  { %3226 = vmatpush3.bf16.msra.mxu1 %v3859_v17 }
 0xe5c   :  { %v1483_v27 = vpop.permute.xlu1 %1482  ;;  %3233 = vmatprep.subr.bf16.mxu1 %v3635_v1 }
 0xe5d   :  { %3041 = vmatmul.mubr.msk.f32.vlgmr.msra.gmra.mrb[14].mxu0 %vm257_vm4, %v1483_v27 }
 0xe5e   :  { %3229 = vmatpush3.bf16.msra.mxu0 %v3855_v16  ;;  %3062 = vmatprep.mubr.msk.f32.mxu0 %vm4377_vm0, %v3634_v0 }
 0xe5f   :  { %3230 = vmatprep.subr.bf16.mxu0 %v3635_v1 }
 0xe62   :  { %3232 = vmatpush3.bf16.msra.mxu0 %v3868_v21 }
 0xe63   :  { %3239 = vmatprep.subr.bf16.mxu0 %v3635_v1 }
 0xf29   :  { %v1446_v28 = vpop.f32.mrb[10].mxu1 }
 0xf2a   :  { %v1451_v29 = vrot.slane %v1446_v28, 6  ;;  %v3031_v30 = vpop.f32.mrb[11].mxu1 }
 0xf2b   :  { %v1600_v30 = vld [vmem:[#allocation2 + $0x8] sm:$0xc] }
 0xf2c   :  { %v1453_v33 = vadd.f32 %v1451_v29, %v1376_v31 }
 0xf2e   :  { %3381 = vtanh.f32 %v1453_v33  ;;  %v2779_v42 = vmul.f32 -1.442695, %v1453_v33 }
 0xf30   :  { %v1552_v34 = vpop.f32.mrb[14].mxu0 }
 0xf31   :  { %v1557_v36 = vrot.slane %v1552_v34, 4  ;;  %v3042_v37 = vpop.f32.mrb[15].mxu0 }
 0xf33   :  { %v1559_v39 = vadd.f32 %v1557_v36, %v1377_v38 }
 0xf35   :  { %3383 = vtanh.f32 %v1559_v39  ;;  %v2781_v44 = vmul.f32 -1.442695, %v1559_v39 }
 0xf36   :  { %3385 = vpow2.f32 %v2779_v42 }
 0xf37   :  { %3387 = vpow2.f32 %v2781_v44 }
 0xf38   :  { %v3382_v40 = vpop.eup %3381 }
 0xf39   :  { %1466 = vrot.lane.b32.xlu0 %v3382_v40, %s3637_s5 }
 0xf3f   :  { %v3384_v41 = vpop.eup %3383 }
 0xf40   :  { %1572 = vrot.lane.b32.xlu1 %v3384_v41, %s3637_s5  ;;  %v3386_v45 = vpop.eup %3385 }
 0xf41   :  { %v1457_v47 = vadd.f32 1.0, %v3386_v45  ;;  %v3388_v48 = vpop.eup %3387 }
 0xf42   :  { %v1563_v49 = vadd.f32 1.0, %v3388_v48 }
 0xf43   :  { %3389 = vrcp.f32 %v1457_v47 }
 0xf44   :  { %3391 = vrcp.f32 %v1563_v49 }
 0xf4d   :  { %v3390_v50 = vpop.eup %3389 }
 0xf4e   :  { %v3392_v53 = vpop.eup %3391  ;;  %v1464_v59 = vmul.f32 %v3390_v50, %v1462_v57 }
 0xf4f   :  { %v1570_v63 = vmul.f32 %v3392_v53, %v1568_v62 }
 0xfab   :  { %v1467_v51 = vpop.permute.xlu0 %1466 }
 0xfac   :  { %v1469_v52 = vmul.f32 %v3390_v50, %v1467_v51 }
 0xfae   :  { %1471 = vrot.lane.b32.xlu0 %v1469_v52, %s3638_s3 }
 0xfb2   :  { %v1573_v54 = vpop.permute.xlu1 %1572 }
 0xfb3   :  { %v1575_v56 = vmul.f32 %v3392_v53, %v1573_v54 }
 0xfb5   :  { %1577 = vrot.lane.b32.xlu1 %v1575_v56, %s3638_s3 }
0x1020   :  { %v1472_v60 = vpop.permute.xlu0 %1471 }
0x1021   :  { %v4086_v61 = vadd.f32 %v1472_v60, %v1464_v59 }
0x1023   :  { %3393 = vtanh.f32 %v4086_v61  ;;  %v1688_v48 = vrot.slane %v4086_v61, 6 }
0x1027   :  { %v1578_v2 = vpop.permute.xlu1 %1577 }
0x1028   :  { %v4090_v3 = vadd.f32 %v1578_v2, %v1570_v63 }
0x102a   :  { %3395 = vtanh.f32 %v4090_v3  ;;  %v1794_v52 = vrot.slane %v4090_v3, 2 }
0x102d   :  { %v3394_v4 = vpop.eup %3393 }
0x102e   :  { %1477 = vrot.lane.b32.xlu0 %v3394_v4, %s3637_s5 }
0x1034   :  { %v3396_v5 = vpop.eup %3395 }
0x1035   :  { %1583 = vrot.lane.b32.xlu1 %v3396_v5, %s3637_s5 }
0x10a0   :  { %v1478_v6 = vpop.permute.xlu0 %1477 }
0x10a1   :  { %v4095_v7 = vmul.f32 %v3390_v50, %v1478_v6 }
0x10a3   :  { %v1601_v8 = vrot.slane %v4095_v7, 2 }
0x10a5   :  { %1602 = vrot.lane.b32.xlu0 %v1601_v8, %s3638_s3 }
0x10a7   :  { %v1584_v10 = vpop.permute.xlu1 %1583 }
0x10a8   :  { %v4099_v12 = vmul.f32 %v3392_v53, %v1584_v10 }
0x10aa   :  { %v1707_v13 = vrot.slane %v4099_v12, 4 }
0x10ac   :  { %1708 = vrot.lane.b32.xlu1 %v1707_v13, %s3638_s3  ;;  %v1825_v13 = vld [vmem:[#allocation2 + $0x10] sm:$0xc0] }
0x1117   :  { %v1603_v14 = vpop.permute.xlu0 %1602 }
0x1118   :  { %3052 = vmatmul.mubr.msk.f32.vlgmr.msra.gmra.mrb[12].mxu1 %vm257_vm4, %v1603_v14 }
0x1119   :  { %3235 = vmatpush3.bf16.msra.mxu1 %v3850_v11  ;;  %3073 = vmatprep.mubr.msk.f32.mxu1 %vm4377_vm0, %v3634_v0 }
0x111a   :  { %3236 = vmatprep.subr.bf16.mxu1 %v3635_v1 }
0x111d   :  { %3238 = vmatpush3.bf16.msra.mxu1 %v3859_v17 }
0x111e   :  { %v1709_v15 = vpop.permute.xlu1 %1708 }
0x111f   :  { %3063 = vmatmul.mubr.msk.f32.vlgmr.msra.gmra.mrb[16].mxu0 %vm257_vm4, %v1709_v15  ;;  %v1826_v15 = vld [vmem:[#allocation2 + $0x8] sm:$0x3] }
0x1120   :  { %3241 = vmatpush3.bf16.msra.mxu0 %v3855_v16  ;;  %3084 = vmatprep.mubr.msk.f32.mxu0 %vm4377_vm0, %v3634_v0 }
0x1121   :  { %3242 = vmatprep.subr.bf16.mxu0 %v3635_v1 }
0x1124   :  { %3244 = vmatpush3.bf16.msra.mxu0 %v3868_v21 }
0x1125   :  { %3087 = vmatprep.subr.mxu0 %v3634_v0 }
0x11eb   :  { %v1672_v11 = vpop.f32.mrb[12].mxu1 }
0x11ec   :  { %v1677_v18 = vrot.slane %v1672_v11, 4  ;;  %v3053_v19 = vpop.f32.mrb[13].mxu1 }
0x11ee   :  { %v1679_v27 = vadd.f32 %v1677_v18, %v1599_v22 }
0x11f0   :  { %3397 = vtanh.f32 %v1679_v27  ;;  %v2783_v21 = vmul.f32 -1.442695, %v1679_v27 }
0x11f2   :  { %v1778_v17 = vpop.f32.mrb[16].mxu0 }
0x11f3   :  { %v1783_v28 = vrot.slane %v1778_v17, 6  ;;  %v3064_v29 = vpop.f32.mrb[17].mxu0 }
0x11f5   :  { %v1785_v16 = vadd.f32 %v1783_v28, %v1600_v30 }
0x11f7   :  { %3399 = vtanh.f32 %v1785_v16  ;;  %v2785_v34 = vmul.f32 -1.442695, %v1785_v16 }
0x11f8   :  { %3401 = vpow2.f32 %v2783_v21 }
0x11f9   :  { %3403 = vpow2.f32 %v2785_v34 }
0x11fa   :  { %v3398_v31 = vpop.eup %3397 }
0x11fb   :  { %1692 = vrot.lane.b32.xlu0 %v3398_v31, %s3637_s5 }
0x1201   :  { %v3400_v33 = vpop.eup %3399 }
0x1202   :  { %1798 = vrot.lane.b32.xlu1 %v3400_v33, %s3637_s5  ;;  %v3402_v36 = vpop.eup %3401 }
0x1203   :  { %v1683_v37 = vadd.f32 1.0, %v3402_v36  ;;  %v3404_v38 = vpop.eup %3403 }
0x1204   :  { %v1789_v39 = vadd.f32 1.0, %v3404_v38 }
0x1205   :  { %3405 = vrcp.f32 %v1683_v37 }
0x1206   :  { %3407 = vrcp.f32 %v1789_v39 }
0x120f   :  { %v3406_v40 = vpop.eup %3405 }
0x1210   :  { %v3408_v44 = vpop.eup %3407  ;;  %v1690_v49 = vmul.f32 %v3406_v40, %v1688_v48 }
0x1211   :  { %v1796_v53 = vmul.f32 %v3408_v44, %v1794_v52 }
0x126d   :  { %v1693_v41 = vpop.permute.xlu0 %1692 }
0x126e   :  { %v1695_v42 = vmul.f32 %v3406_v40, %v1693_v41 }
0x1270   :  { %1697 = vrot.lane.b32.xlu0 %v1695_v42, %s3638_s3 }
0x1274   :  { %v1799_v45 = vpop.permute.xlu1 %1798 }
0x1275   :  { %v1801_v47 = vmul.f32 %v3408_v44, %v1799_v45 }
0x1277   :  { %1803 = vrot.lane.b32.xlu1 %v1801_v47, %s3638_s3 }
0x12e2   :  { %v1698_v50 = vpop.permute.xlu0 %1697 }
0x12e3   :  { %v1700_v51 = vadd.f32 %v1698_v50, %v1690_v49 }
0x12e5   :  { %3409 = vtanh.f32 %v1700_v51  ;;  %v1914_v39 = vrot.slane %v1700_v51, 6 }
0x12e9   :  { %v1804_v54 = vpop.permute.xlu1 %1803 }
0x12ea   :  { %v1806_v56 = vadd.f32 %v1804_v54, %v1796_v53  ;;  %v2059_v53 = vld [vmem:[%s4365_s6 + $0x48] sm:$0xff]  ;;  %v2061_v54 = vld [vmem:[%s4365_s6 + $0x58] sm:$0xff] }
0x12ec   :  { %3411 = vtanh.f32 %v1806_v56 }
0x12ef   :  { %v3410_v57 = vpop.eup %3409 }
0x12f0   :  { %1703 = vrot.lane.b32.xlu0 %v3410_v57, %s3637_s5  ;;  %v2058_v57 = vld [vmem:[%s4365_s6 + $0x40] sm:$0xff] }
0x12f6   :  { %v3412_v59 = vpop.eup %3411 }
0x12f7   :  { %1809 = vrot.lane.b32.xlu1 %v3412_v59, %s3637_s5  ;;  %v2060_v59 = vld [vmem:[%s4365_s6 + $0x50] sm:$0xff] }
0x1362   :  { %v1704_v60 = vpop.permute.xlu0 %1703 }
0x1363   :  { %v4124_v62 = vmul.f32 %v3406_v40, %v1704_v60  ;;  %v2063_v60 = vld [vmem:[%s4365_s6 + $0x68] sm:$0xff] }
0x1365   :  { %v1827_v61 = vrot.slane %v4124_v62, 4 }
0x1367   :  { %1828 = vrot.lane.b32.xlu0 %v1827_v61, %s3638_s3  ;;  %v2065_v61 = vld [vmem:[%s4365_s6 + $0x78] sm:$0xff] }
0x1369   :  { %v1810_v63 = vpop.permute.xlu1 %1809 }
0x136a   :  { %v4128_v2 = vmul.f32 %v3408_v44, %v1810_v63  ;;  %v2017_v44 = vrot.slane %v1806_v56, 2  ;;  %v3253_v56 = vpack.c.bf16 %v2061_v54, %v2059_v53  ;;  %v2062_v63 = vld [vmem:[%s4365_s6 + $0x60] sm:$0xff] }
0x136c   :  { %v1933_v3 = vrot.slane %v4128_v2, 2 }
0x136e   :  { %1934 = vrot.lane.b32.xlu1 %v1933_v3, %s3638_s3  ;;  %v3257_v3 = vpack.c.bf16 %v2065_v61, %v2063_v60 }
0x13d9   :  { %v1829_v4 = vpop.permute.xlu0 %1828 }
0x13da   :  { %3074 = vmatmul.mubr.msk.f32.vlgmr.msra.gmra.mrb[14].mxu1 %vm257_vm4, %v1829_v4 }
0x13db   :  { %2149 = vmatprep.mubr.f32.mxu1 %v3634_v0 }
0x13e0   :  { %v1935_v5 = vpop.permute.xlu1 %1934 }
0x13e1   :  { %3085 = vmatmul.mubr.msk.f32.vlgmr.msra.gmra.mrb[18].mxu0 %vm257_vm4, %v1935_v5  ;;  %vm1142_vm4 = vcmask 260102  }
0x13e2   :  { %3089 = vmatprep.mubr.msk.f32.mxu0 %vm4377_vm0, %v3634_v0  ;;  %vm1150_vm0 = vcmask 261127  }
0x14ad   :  { %v1898_v6 = vpop.f32.mrb[14].mxu1 }
0x14ae   :  { %v1903_v8 = vrot.slane %v1898_v6, 2  ;;  %v3075_v10 = vpop.f32.mrb[15].mxu1 }
0x14b0   :  { %v1905_v14 = vadd.f32 %v1903_v8, %v1825_v13 }
0x14b2   :  { %3413 = vtanh.f32 %v1905_v14  ;;  %v2787_v17 = vmul.f32 -1.442695, %v1905_v14 }
0x14b4   :  { %v2004_v11 = vpop.f32.mrb[18].mxu0 }
0x14b5   :  { %v2008_v18 = vadd.f32 %v2004_v11, %v1826_v15  ;;  %v3086_v19 = vpop.f32.mrb[19].mxu0 }
0x14b7   :  { %3415 = vtanh.f32 %v2008_v18  ;;  %v2789_v28 = vmul.f32 -1.442695, %v2008_v18 }
0x14b8   :  { %3417 = vpow2.f32 %v2787_v17 }
0x14b9   :  { %3419 = vpow2.f32 %v2789_v28 }
0x14bc   :  { %v3414_v22 = vpop.eup %3413 }
0x14bd   :  { %1918 = vrot.lane.b32.xlu0 %v3414_v22, %s3637_s5 }
0x14c1   :  { %v3416_v27 = vpop.eup %3415 }
0x14c2   :  { %2021 = vrot.lane.b32.xlu1 %v3416_v27, %s3637_s5  ;;  %v3418_v29 = vpop.eup %3417 }
0x14c3   :  { %v1909_v30 = vadd.f32 1.0, %v3418_v29  ;;  %v3420_v16 = vpop.eup %3419 }
0x14c4   :  { %v2012_v31 = vadd.f32 1.0, %v3420_v16 }
0x14c5   :  { %3421 = vrcp.f32 %v1909_v30 }
0x14c6   :  { %3423 = vrcp.f32 %v2012_v31 }
0x14cf   :  { %v4139_v33 = vpop.eup %3421 }
0x14d0   :  { %v4143_v36 = vpop.eup %3423  ;;  %v1916_v40 = vmul.f32 %v4139_v33, %v1914_v39 }
0x14d1   :  { %v2019_v45 = vmul.f32 %v4143_v36, %v2017_v44 }
0x152f   :  { %v1919_v21 = vpop.permute.xlu0 %1918 }
0x1530   :  { %v1921_v34 = vmul.f32 %v4139_v33, %v1919_v21  ;;  %v2066_v21 = vld [vmem:[%s4366_s7] sm:$0x3] }
0x1531   :  { %v2075_v39 = vrot.slane %v2066_v21, %v155_v26 }
0x1532   :  { %1923 = vrot.lane.b32.xlu0 %v1921_v34, %s3638_s3  ;;  %v2071_v34 = vrot.slane %v2066_v21, %v3895_v24 }
0x1534   :  { %v2022_v37 = vpop.permute.xlu1 %2021 }
0x1535   :  { %v2024_v38 = vmul.f32 %v4143_v36, %v2022_v37 }
0x1537   :  { %2026 = vrot.lane.b32.xlu1 %v2024_v38, %s3638_s3 }
0x15a4   :  { %v1924_v41 = vpop.permute.xlu0 %1923 }
0x15a5   :  { %v1926_v42 = vadd.f32 %v1924_v41, %v1916_v40 }
0x15a7   :  { %3425 = vtanh.f32 %v1926_v42 }
0x15a9   :  { %v2027_v47 = vpop.permute.xlu1 %2026 }
0x15aa   :  { %v2029_v48 = vadd.f32 %v2027_v47, %v2019_v45 }
0x15ac   :  { %3427 = vtanh.f32 %v2029_v48 }
0x15b1   :  { %v3426_v49 = vpop.eup %3425 }
0x15b2   :  { %1929 = vrot.lane.b32.xlu0 %v3426_v49, %s3637_s5  ;;  %v2320_v49 = vld [vmem:[%s4360_s1] sm:$0x1] }
0x15b6   :  { %v3428_v50 = vpop.eup %3427  ;;  %461 = vrot.lane.b32.xlu0 %v3917_v9, %s3637_s5  ;;  %v2051_v9 = vld [vmem:[%s4365_s6 + $0x8] sm:$0xff] }
0x15b7   :  { %2032 = vrot.lane.b32.xlu1 %v3428_v50, %s3637_s5  ;;  %v2321_v50 = vld [vmem:[%s4360_s1 + $0x1] sm:$0x1] }
0x15ba   :  { %688 = vrot.lane.b32.xlu0 %v3955_v58, %s3637_s5  ;;  %v2053_v58 = vld [vmem:[%s4365_s6 + $0x18] sm:$0xff] }
0x15bb   :  { %682 = vrot.lane.b32.xlu1 %v3951_v55, %s3638_s3  ;;  %v2050_v55 = vld [vmem:[%s4365_s6] sm:$0xff] }
0x15be   :  { %918 = vrot.lane.b32.xlu0 %v3991_v46, %s3637_s5  ;;  %v3245_v46 = vpack.c.bf16 %v2053_v58, %v2051_v9  ;;  %v3639_v9 = vmov 0  }
0x15bf   :  { %912 = vrot.lane.b32.xlu1 %v3987_v43, %s3638_s3  ;;  %v2052_v43 = vld [vmem:[%s4365_s6 + $0x10] sm:$0xff] }
0x15c0   :  { %3246 = vmatprep.subr.bf16.mxu1 %v3245_v46 }
0x15c2   :  { %1145 = vrot.lane.b32.xlu0 %v4027_v35, %s3637_s5  ;;  %v3247_v35 = vpack.c.bf16 %v2052_v43, %v2050_v55 }
0x15c3   :  { %1139 = vrot.lane.b32.xlu1 %v4023_v32, %s3638_s3  ;;  %v2055_v32 = vld [vmem:[%s4365_s6 + $0x28] sm:$0xff] }
0x15c4   :  { %3248 = vmatpush1.bf16.msra.mxu1 %v3247_v35 }
0x15c6   :  { %1588 = vrot.lane.b32.xlu0 %v4095_v7, %s3638_s3  ;;  %v2057_v7 = vld [vmem:[%s4365_s6 + $0x38] sm:$0xff] }
0x15c7   :  { %1370 = vrot.lane.b32.xlu1 %v4060_v20, %s3637_s5  ;;  %v2054_v20 = vld [vmem:[%s4365_s6 + $0x20] sm:$0xff]  ;;  %v3249_v51 = vpack.c.bf16 %v2057_v7, %v2055_v32 }
0x15c9   :  { %3250 = vmatprep.subr.bf16.mxu1 %v3249_v51 }
0x15ca   :  { %1814 = vrot.lane.b32.xlu0 %v4124_v62, %s3638_s3  ;;  %v3255_v62 = vpack.c.bf16 %v2060_v59, %v2058_v57 }
0x15cb   :  { %1593 = vrot.lane.b32.xlu1 %v4099_v12, %s3637_s5  ;;  %v2056_v12 = vld [vmem:[%s4365_s6 + $0x30] sm:$0xff] }
0x15cc   :  { %v3251_v52 = vpack.c.bf16 %v2056_v12, %v2054_v20 }
0x15ce   :  { %3252 = vmatpush1.bf16.msra.mxu1 %v3251_v52 }
0x15cf   :  { %1819 = vrot.lane.b32.xlu1 %v4128_v2, %s3637_s5  ;;  %v2064_v2 = vld [vmem:[%s4365_s6 + $0x70] sm:$0xff]  ;;  %3254 = vmatprep.subr.bf16.mxu1 %v3253_v56 }
0x15d0   :  { %v3259_v4 = vpack.c.bf16 %v2064_v2, %v2062_v63 }
0x15d2   :  { %3256 = vmatpush1.bf16.msra.mxu1 %v3255_v62 }
0x15d3   :  { %3258 = vmatprep.subr.bf16.mxu1 %v3257_v3 }
0x15d6   :  { %3260 = vmatpush1.bf16.msra.mxu1 %v3259_v4  ;;  %v2524_v4 = vld [vmem:[#allocation9] sm:$0xff] }
0x15d7   :  { %3261 = vmatprep.subr.bf16.mxu1 %v3635_v1 }
0x1624   :  { %v1930_v5 = vpop.permute.xlu0 %1929 }
0x1625   :  { %v1932_v6 = vmul.f32 %v4139_v33, %v1930_v5  ;;  %v2525_v5 = vld [vmem:[#allocation9 + $0x8] sm:$0xff] }
0x1627   :  { %2037 = vrot.lane.b32.xlu0 %v1932_v6, %s3638_s3  ;;  %v2526_v6 = vld [vmem:[#allocation9 + $0x10] sm:$0xff] }
0x1628   :  { %v462_v8 = vpop.permute.xlu0 %461 }
0x1629   :  { %465 = vst.msk [vmem:[#allocation3 + $0x1] sm:$0x40] %vm464_vm5, %v462_v8  ;;  %v2033_v10 = vpop.permute.xlu1 %2032 }
0x162a   :  { %469 = vst.msk [vmem:[#allocation3 + $0x8] sm:$0x80] %vm468_vm6, %v462_v8  ;;  %v2035_v13 = vmul.f32 %v4143_v36, %v2033_v10  ;;  %v3262_v8 = vpack.c.bf16 %v2525_v5, %v2524_v4  ;;  %v2527_v10 = vld [vmem:[#allocation9 + $0x18] sm:$0xff]  ;;  %v2802_v5 = vld [vmem:[#allocation10] ss:$0 sm:$0xff] }
0x162c   :  { %2042 = vrot.lane.b32.xlu1 %v2035_v13, %s3637_s5  ;;  %v689_v14 = vpop.permute.xlu0 %688  ;;  %v3265_v13 = vpack.c.bf16 %v2527_v10, %v2526_v6  ;;  %v2803_v10 = vld [vmem:[#allocation15] ss:$0 sm:$0xff] }
0x162d   :  { %692 = vst.msk [vmem:[#allocation3 + $0x2] sm:$0x10] %vm691_vm7, %v689_v14  ;;  %v683_v15 = vpop.permute.xlu1 %682 }
0x162e   :  { %696 = vst.msk [vmem:[#allocation3 + $0x9] sm:$0x20] %vm695_vm8, %v689_v14 }
0x162f   :  { %686 = vst.msk [vmem:[#allocation3 - $0x1] sm:$0x4] %vm685_vm9, %v683_v15 }
0x1630   :  { %694 = vst.msk [vmem:[#allocation3 + $0x6] sm:$0x8] %vm693_vm10, %v683_v15  ;;  %v919_v11 = vpop.permute.xlu0 %918 }
0x1631   :  { %922 = vst.msk [vmem:[#allocation3 + $0x3] sm:$0x4] %vm921_vm11, %v919_v11  ;;  %v913_v18 = vpop.permute.xlu1 %912 }
0x1632   :  { %926 = vst.msk [vmem:[#allocation3 + $0xa] sm:$0x8] %vm925_vm12, %v919_v11 }
0x1633   :  { %916 = vst.msk [vmem:[#allocation3 - $0x2] sm:$0x10] %vm915_vm13, %v913_v18 }
0x1634   :  { %924 = vst.msk [vmem:[#allocation3 + $0x5] sm:$0x20] %vm923_vm14, %v913_v18  ;;  %v1146_v19 = vpop.permute.xlu0 %1145 }
0x1635   :  { %1149 = vst.msk [vmem:[#allocation3 + $0x4] sm:$0x1] %vm1148_vm15, %v1146_v19  ;;  %v1140_v22 = vpop.permute.xlu1 %1139 }
0x1636   :  { %1153 = vst.msk [vmem:[#allocation3 + $0xb] sm:$0x2] %vm1152_vm1, %v1146_v19 }
0x1637   :  { %1368 = vst.msk [vmem:[#allocation3 + $0x4] sm:$0x1] %vm458_vm2, %v4064_v25  ;;  %vm2078_vm2 = vcmask 523264  }
0x1638   :  { %1374 = vst.msk [vmem:[#allocation3 + $0xb] sm:$0x2] %vm466_vm3, %v4064_v25  ;;  %v1589_v27 = vpop.permute.xlu0 %1588  ;;  %vm4381_vm3 = vmmov 0  }
0x1639   :  { %1143 = vst.msk [vmem:[#allocation3 - $0x3] sm:$0x40] %vm1142_vm4, %v1140_v22  ;;  %v1371_v17 = vpop.permute.xlu1 %1370 }
0x163a   :  { %1151 = vst.msk [vmem:[#allocation3 + $0x4] sm:$0x80] %vm1150_vm0, %v1140_v22 }
0x163b   :  { %1591 = vst.msk [vmem:[#allocation3 + $0x3] sm:$0x4] %vm685_vm9, %v1589_v27  ;;  %vm2542_vm9 = vcmask 1041409  }
0x163c   :  { %1597 = vst.msk [vmem:[#allocation3 + $0xa] sm:$0x8] %vm693_vm10, %v1589_v27  ;;  %v1815_v28 = vpop.permute.xlu0 %1814  ;;  %vm2738_vm10 = vcmask 25600  }
0x163d   :  { %1373 = vst.msk [vmem:[#allocation3 - $0x3] sm:$0x40] %vm464_vm5, %v1371_v17  ;;  %v1594_v25 = vpop.permute.xlu1 %1593  ;;  %vm2323_vm5 = vcmp.gt.f32.partialorder %v2321_v50, 0.5 }
0x163e   :  { %1375 = vst.msk [vmem:[#allocation3 + $0x4] sm:$0x80] %vm468_vm6, %v1371_v17  ;;  %v2325_v46 = vsel %vm2323_vm5, 1, %v3639_v9 }
0x163f   :  { %1817 = vst.msk [vmem:[#allocation3 + $0x2] sm:$0x10] %vm915_vm13, %v1815_v28  ;;  %v2333_v43 = vrot.slane %v2325_v46, %v3895_v24 }
0x1640   :  { %1823 = vst.msk [vmem:[#allocation3 + $0x9] sm:$0x20] %vm923_vm14, %v1815_v28 }
0x1641   :  { %1596 = vst.msk [vmem:[#allocation3 - $0x2] sm:$0x10] %vm691_vm7, %v1594_v25  ;;  %v1820_v29 = vpop.permute.xlu1 %1819  ;;  %vm2338_vm7 = vcmask 64512  }
0x1642   :  { %1598 = vst.msk [vmem:[#allocation3 + $0x5] sm:$0x20] %vm695_vm8, %v1594_v25  ;;  %vm2335_vm8 = vcmp.eq.s32.totalorder %v2333_v43, 1  ;;  %v2652_v43 = vld [vmem:[%s4373_s14 + $0x10] sm:$0xff] }
0x1643   :  { %1822 = vst.msk [vmem:[#allocation3 - $0x1] sm:$0x4] %vm921_vm11, %v1820_v29 }
0x1644   :  { %1824 = vst.msk [vmem:[#allocation3 + $0x6] sm:$0x8] %vm925_vm12, %v1820_v29 }
0x1699   :  { %v2038_v30 = vpop.permute.xlu0 %2037 }
0x169a   :  { %2040 = vst.msk [vmem:[#allocation3 + $0x1] sm:$0x40] %vm1142_vm4, %v2038_v30 }
0x169b   :  { %2046 = vst.msk [vmem:[#allocation3 + $0x8] sm:$0x80] %vm1150_vm0, %v2038_v30  ;;  %vm2322_vm0 = vcmp.gt.f32.partialorder %v2320_v49, 0.5 }
0x169c   :  { %v2324_v58 = vsel %vm2322_vm0, 1, %v3639_v9 }
0x169d   :  { %v2329_v55 = vrot.slane %v2324_v58, %v3895_v24 }
0x169e   :  { %v2043_v16 = vpop.permute.xlu1 %2042 }
0x169f   :  { %2045 = vst.msk [vmem:[#allocation3] sm:$0x1] %vm1148_vm15, %v2043_v16  ;;  %vm2334_vm6 = vcmp.eq.s32.totalorder %v2329_v55, 1 }
0x16a0   :  { %2047 = vst.msk [vmem:[#allocation3 + $0x7] sm:$0x2] %vm1152_vm1, %v2043_v16 }
0x16a6   :  { %v2048_v31 = vld [vmem:[#allocation3] sm:$0xff] }
0x16a7   :  { %2790 = vmatmul.mubr.msk.f32.vlgmr.msra.gmra.mrb[16].mxu1 %vm2078_vm2, %v2048_v31  ;;  %v2049_v33 = vld [vmem:[#allocation3 + $0x8] sm:$0xff] }
0x16a8   :  { %2155 = vmatprep.mubr.f32.mxu1 %v3634_v0  ;;  %3263 = vmatpush3.bf16.msra.mxu1 %v3262_v8 }
0x16a9   :  { %3264 = vmatprep.subr.bf16.mxu1 %v3635_v1 }
0x16ab   :  { %2791 = vmatmul.mubr.msk.f32.gmra.mrb[18].mxu1 %vm2078_vm2, %v2049_v33 }
0x16ac   :  { %3123 = vmatprep.mubr.msk.f32.mxu1 %vm4381_vm3, %v3634_v0  ;;  %3266 = vmatpush3.bf16.msra.mxu1 %v3265_v13 }
0x16ad   :  { %3267 = vmatprep.subr.bf16.mxu1 %v3635_v1 }
0x177a   :  { %v2151_v36 = vpop.f32.mrb[16].mxu1 }
0x177b   :  { %v2152_v37 = vadd.f32 %v2151_v36, %v2071_v34  ;;  %v2153_v38 = vpop.f32.mrb[17].mxu1 }
0x177c   :  { %v2154_v26 = vadd.f32 %v2153_v38, %v2075_v39 }
0x177d   :  { %2165 = vrot.lane.b32.xlu0 %v2152_v37, %s3637_s5  ;;  %v2162_v47 = vmul.f32 0.125, %v2152_v37 }
0x177e   :  { %v2157_v40 = vpop.f32.mrb[18].mxu1 }
0x177f   :  { %v2158_v41 = vadd.f32 %v2157_v40, %v2071_v34  ;;  %v2159_v42 = vpop.f32.mrb[19].mxu1 }
0x1780   :  { %v4272_v44 = vadd.f32 %v2159_v42, %v2075_v39  ;;  %v2529_v42 = vld [vmem:[#allocation9 + $0x28] sm:$0xff] }
0x1781   :  { %2243 = vrot.lane.b32.xlu1 %v2158_v41, %s3637_s5  ;;  %v2163_v23 = vmul.f32 0.125, %v2158_v41  ;;  %v2528_v41 = vld [vmem:[#allocation9 + $0x20] sm:$0xff] }
0x17ef   :  { %v2166_v45 = vpop.permute.xlu0 %2165 }
0x17f0   :  { %3088 = vmatpush3.xpose.msk.msra.mxu0 %vm2078_vm2, %v2166_v45  ;;  %v3268_v45 = vpack.c.bf16 %v2529_v42, %v2528_v41 }
0x17f1   :  { %3092 = vmatprep.subr.mxu0 %v3634_v0 }
0x17f2   :  { %3269 = vmatpush3.bf16.msra.mxu1 %v3268_v45 }
0x17f3   :  { %v2244_v48 = vpop.permute.xlu1 %2243  ;;  %3090 = vmatmul.mubr.msk.f32.vlgmr.msra.gmra.mrb[20].mxu0 %vm2078_vm2, %v2162_v47  ;;  %3270 = vmatprep.subr.bf16.mxu1 %v3635_v1  ;;  %v2530_v47 = vld [vmem:[#allocation9 + $0x30] sm:$0xff] }
0x17f4   :  { %3093 = vmatpush3.xpose.msk.msra.mxu0 %vm2078_vm2, %v2244_v48  ;;  %3094 = vmatprep.mubr.msk.f32.mxu0 %vm4381_vm3, %v3634_v0  ;;  %v2531_v48 = vld [vmem:[#allocation9 + $0x38] sm:$0xff] }
0x17f5   :  { %3097 = vmatprep.subr.mxu0 %v3634_v0 }
0x17f7   :  { %3095 = vmatmul.mubr.msk.f32.vlgmr.msra.gmra.mrb[22].mxu0 %vm2078_vm2, %v2163_v23  ;;  %v2650_v23 = vld [vmem:[%s4373_s14] sm:$0xff] }
0x17f8   :  { %3098 = vmatpush3.msra.mxu0 %v2154_v26  ;;  %3099 = vmatprep.mubr.msk.f32.mxu0 %vm4381_vm3, %v3634_v0  ;;  %v2651_v26 = vld [vmem:[%s4373_s14 + $0x8] sm:$0xff] }
0x17f9   :  { %3102 = vmatprep.subr.mxu0 %v3634_v0  ;;  %v3274_v49 = vpack.c.bf16 %v2651_v26, %v2650_v23 }
0x18c6   :  { %v2238_v35 = vpop.f32.mrb[20].mxu0 }
0x18c7   :  { %v2336_v32 = vsel %vm2334_vm6, -1e+30, %v2238_v35  ;;  %v3091_v7 = vpop.f32.mrb[21].mxu0  ;;  %v2653_v35 = vld [vmem:[%s4373_s14 + $0x18] sm:$0xff] }
0x18c8   :  { %v2339_v20 = vsel %vm2338_vm7, %v2336_v32, -inf  ;;  %v2654_v7 = vld [vmem:[%s4373_s14 + $0x20] sm:$0xff] }
0x18c9   :  { %2340 = vmax.xlane.f32.xlu0 %v2339_v20  ;;  %v2655_v20 = vld [vmem:[%s4373_s14 + $0x28] sm:$0xff] }
0x18ca   :  { %v2316_v51 = vpop.f32.mrb[22].mxu0 }
0x18cb   :  { %v2337_v12 = vsel %vm2335_vm8, -1e+30, %v2316_v51  ;;  %v3096_v52 = vpop.f32.mrb[23].mxu0  ;;  %v3280_v51 = vpack.c.bf16 %v2655_v20, %v2654_v7 }
0x18cc   :  { %v2342_v53 = vsel %vm2338_vm7, %v2337_v12, -inf  ;;  %v2657_v52 = vld [vmem:[%s4373_s14 + $0x38] sm:$0xff] }
0x18cd   :  { %2343 = vmax.xlane.f32.xlu1 %v2342_v53 }
0x1956   :  { %v2341_v54 = vpop.xlane.xlu0 %2340 }
0x1957   :  { %v2345_v56 = vsub.f32 %v2336_v32, %v2341_v54  ;;  %v3277_v32 = vpack.c.bf16 %v2653_v35, %v2652_v43  ;;  %v2624_v54 = vld [vmem:[#allocation13] sm:$0x1] }
0x1959   :  { %v2347_v57 = vmul.f32 1.442695, %v2345_v56  ;;  %v2625_v56 = vadd.f32 1e-05, %v2624_v54 }
0x195a   :  { %v2344_v59 = vpop.xlane.xlu1 %2343 }
0x195b   :  { %3429 = vpow2.f32 %v2347_v57  ;;  %v2346_v60 = vsub.f32 %v2337_v12, %v2344_v59  ;;  %v2656_v12 = vld [vmem:[%s4373_s14 + $0x30] sm:$0xff]  ;;  %v2798_v59 = vld [vmem:[%s4368_s9] ss:$0 sm:$0xff]  ;;  %s3640_s14 = smov [#allocation16]  }
0x195c   :  { %v3283_v53 = vpack.c.bf16 %v2657_v52, %v2656_v12  ;;  %s2746_s9 = sshll.u32 %s3640_s14, 4  ;;  %s2747_s9 = int_to_ptr.vmem [resolvable:$true] %s2746_s9 }
0x195d   :  { %v2349_v62 = vmul.f32 1.442695, %v2346_v60  ;;  %s3593_s24 = scalar_lea.vmem %s2747_s9, 32  ;;  %p3598_p1 = scmp.lt.s32.totalorder %s2747_s9, %s2747_s9 }
0x195e   :  { %p3594_p0 = scmp.ne.s32.totalorder %s2747_s9, %s3593_s24  ;;  %p3599_p2 = scmp.lt.s32.totalorder %s3593_s24, %s3593_s24 }
0x195f   :  { %3431 = vpow2.f32 %v2349_v62 }
0x1960   :  { %p3600_p3 = por %p3599_p2, %p3598_p1 }
0x1962   :  { %p3601_p4 = pnand %p3600_p3, %p3594_p0 }
0x1965   :  { %v3430_v61 = vpop.eup %3429 }
0x1966   :  { %v2351_v63 = vsel %vm2338_vm7, %v3430_v61, 0.0 }
0x1967   :  { %2352 = vadd.xlane.f32.xlu0 %v2351_v63 }
0x1969   :  { %v3432_v2 = vpop.eup %3431 }
0x196a   :  { %v2354_v3 = vsel %vm2338_vm7, %v3432_v2, 0.0 }
0x196b   :  { %2355 = vadd.xlane.f32.xlu0 %v2354_v3  ;;  %v2801_v3 = vld [vmem:[%s4369_s10] ss:$0 sm:$0xff] }
0x19f4   :  { %v2353_v14 = vpop.xlane.xlu0 %2352 }
0x19f5   :  { %3433 = vrcp.f32 %v2353_v14 }
0x19f8   :  { %v2356_v15 = vpop.xlane.xlu0 %2355 }
0x19f9   :  { %3435 = vrcp.f32 %v2356_v15 }
0x19fa   :  { %3437 = vrsqrt.f32 %v2625_v56 }
0x19ff   :  { %v3434_v11 = vpop.eup %3433 }
0x1a00   :  { %v2359_v18 = vmul.f32 %v3434_v11, %v3430_v61 }
0x1a02   :  { %v2361_v19 = vsel %vm2338_vm7, %v2359_v18, 0.0 }
0x1a03   :  { %v3436_v22 = vpop.eup %3435  ;;  %v2362_v27 = vrot.slane %v2361_v19, 4 }
0x1a04   :  { %v2360_v17 = vmul.f32 %v3436_v22, %v3432_v2  ;;  %v3438_v57 = vpop.eup %3437 }
0x1a05   :  { %v2363_v28 = vadd.f32 %v2362_v27, %v2361_v19  ;;  %v2631_v61 = vrot.slane %v3438_v57, %v3895_v24 }
0x1a06   :  { %v2368_v25 = vsel %vm2338_vm7, %v2360_v17, 0.0 }
0x1a07   :  { %v2369_v29 = vrot.slane %v2368_v25, 4  ;;  %v2364_v30 = vrot.slane %v2363_v28, 2 }
0x1a09   :  { %v2370_v16 = vadd.f32 %v2369_v29, %v2368_v25  ;;  %v2365_v31 = vadd.f32 %v2364_v30, %v2363_v28 }
0x1a0b   :  { %v2371_v33 = vrot.slane %v2370_v16, 2  ;;  %v2366_v21 = vrot.slane %v2365_v31, 1 }
0x1a0d   :  { %v2367_v34 = vadd.f32 %v2366_v21, %v2365_v31  ;;  %v2372_v36 = vadd.f32 %v2371_v33, %v2370_v16 }
0x1a0f   :  { %v2376_v37 = vmul.f32 0.125, %v2367_v34  ;;  %v2373_v38 = vrot.slane %v2372_v36, 1 }
0x1a11   :  { %3100 = vmatmul.mubr.msk.f32.vlgmr.msra.gmra.mrb[24].mxu0 %vm2338_vm7, %v2376_v37  ;;  %v2374_v39 = vadd.f32 %v2373_v38, %v2372_v36 }
0x1a12   :  { %3103 = vmatpush3.msra.mxu0 %v4272_v44  ;;  %3104 = vmatprep.mubr.msk.f32.mxu0 %vm4381_vm3, %v3634_v0  ;;  %v3271_v44 = vpack.c.bf16 %v2531_v48, %v2530_v47 }
0x1a13   :  { %v2377_v40 = vmul.f32 0.125, %v2374_v39  ;;  %3273 = vmatprep.subr.bf16.mxu0 %v3635_v1 }
0x1a14   :  { %3272 = vmatpush3.bf16.msra.mxu1 %v3271_v44 }
0x1a15   :  { %3105 = vmatmul.mubr.msk.f32.vlgmr.msra.gmra.mrb[26].mxu0 %vm2338_vm7, %v2377_v40 }
0x1a16   :  { %3142 = vmatprep.mubr.msk.f32.mxu0 %vm4381_vm3, %v3634_v0  ;;  %3275 = vmatpush3.bf16.msra.mxu0 %v3274_v49 }
0x1a17   :  { %3276 = vmatprep.subr.bf16.mxu0 %v3635_v1 }
0x1a1a   :  { %3278 = vmatpush3.bf16.msra.mxu0 %v3277_v32 }
0x1a1b   :  { %3279 = vmatprep.subr.bf16.mxu0 %v3635_v1 }
0x1a1e   :  { %3281 = vmatpush3.bf16.msra.mxu0 %v3280_v51 }
0x1a1f   :  { %3282 = vmatprep.subr.bf16.mxu0 %v3635_v1  ;;  %v2800_v1 = vld [vmem:[#allocation12] ss:$0 sm:$0xff] }
0x1a22   :  { %3284 = vmatpush3.bf16.msra.mxu0 %v3283_v53 }
0x1ae4   :  { %v2447_v0 = vpop.f32.mrb[24].mxu0 }
0x1ae5   :  { %v3101_v50 = vpop.f32.mrb[25].mxu0 }
0x1ae8   :  { %v2520_v9 = vpop.f32.mrb[26].mxu0 }
0x1ae9   :  { %v2541_v58 = vrot.slane %v2520_v9, 7  ;;  %v3106_v55 = vpop.f32.mrb[27].mxu0 }
0x1aeb   :  { %v2543_v46 = vsel %vm2542_vm9, %v2541_v58, %v2447_v0 }
0x1aec   :  { %3124 = vmatmul.mubr.msk.f32.vlgmr.msra.gmra.mrb[20].mxu1 %vm2078_vm2, %v2543_v46 }
0x1bbf   :  { %v2612_v60 = vpop.f32.mrb[20].mxu1 }
0x1bc0   :  { %v2613_v62 = vadd.f32 %v2798_v59, %v2612_v60  ;;  %v3125_v63 = vpop.f32.mrb[21].mxu1 }
0x1bc2   :  { %v2623_v2 = vsub.f32 %v2613_v62, %v2800_v1 }
0x1bc4   :  { %v2633_v4 = vmul.f32 %v2631_v61, %v2623_v2 }
0x1bc6   :  { %v2641_v6 = vmul.f32 %v2801_v3, %v2633_v4 }
0x1bc8   :  { %v2649_v8 = vadd.f32 %v2802_v5, %v2641_v6 }
0x1bca   :  { %3143 = vmatmul.mubr.msk.f32.vlgmr.msra.gmra.mrb[28].mxu0 %vm2078_vm2, %v2649_v8 }
0x1c9d   :  { %v2734_v13 = vpop.f32.mrb[28].mxu0 }
0x1c9e   :  { %v2735_v14 = vadd.f32 %v2803_v10, %v2734_v13  ;;  %v3144_v15 = vpop.f32.mrb[29].mxu0 }
0x1ca0   :  { %2739 = vst.msk [vmem:[#allocation16] sm:$0x3] %vm2738_vm10, %v2735_v14 }
0x1ca1   :  { %3604 = shalt.err (!%p3601_p4)
}
0x1ca2   :  { %s3605_s3 = scalar_lea.hbm %s4375_s16, 32 }
0x1ca3   :  { %p3606_p5 = scmp.ne.s32.totalorder %s4375_s16, %s3605_s3  ;;  %p3609_p6 = scmp.lt.u32.totalorder %s3605_s3, %s4375_s16 }
0x1ca5   :  { %p3611_p7 = pnand %p3609_p6, %p3606_p5 }
0x1ca7   :  { %3614 = shalt.err (!%p3611_p7)
}
0x1ca8   :  { %2749 = dma.vmem_to_hbm [thread:$0]  %s2747_s9, 32, %s4375_s16, [#allocation6]  }
0x1ca9   :  { %3623 = dma.done.wait [#allocation6], 32  }
0x1caa   :  { %3624 = vsyncadd [#allocation6], 4294967264 }
0x1cab   :  { %2753 = vsyncpa [#allocation5], 1 }
0x1cac   :  { %2754 = vsyncpa [#allocation8], 1 }
0x1cad   :  { %2755 = vsyncpa [#allocation11], 1 }
0x1cae   :  { %2756 = vsyncpa [#allocation14], 1 }
0x1caf   :  { %2757 = vsyncpa [#allocation6], 1 }

</bundles_post_ra>
